<compile_context>
chip_gen: v7x
topology: tpu7x:2x2x1
jax: 0.10.0
libtpu: 0.0.40
codegen_flags: <defaults>
</compile_context>

<pallas_src>
import math

import jax
import jax.numpy as jnp
from jax.experimental import pallas as pl
from jax.experimental.pallas import tpu as pltpu


VOLUME_EPS = 0.1
VOLUME_RESTRICT = (8.0, 10.0, 12.0)
LEAKY_SLOPE = 0.01          # torch.nn.LeakyReLU default
HEAD_PAD = 128              # final head padded from 7 -> 128 lanes
DEFAULT_TM = 1024           # row tile (sized for v7x's 64 MiB VMEM)


def _round_up(x, m):
    return ((x + m - 1) // m) * m


def _decoder_kernel(x_ref, w1_ref, b1_ref, w2_ref, b2_ref, w3_ref, b3_ref,
                    out_ref):
    # x tile: (TM, D) bf16
    x = x_ref[...]

    # fc1: (TM, D) @ (D, 1024) -> f32 acc, bias + LeakyReLU in f32, cast bf16
    h1 = jnp.dot(x, w1_ref[...], preferred_element_type=jnp.float32) + b1_ref[...]
    h1 = jnp.where(h1 > 0, h1, LEAKY_SLOPE * h1).astype(jnp.bfloat16)

    # fc2: (TM, 1024) @ (1024, 512)
    h2 = jnp.dot(h1, w2_ref[...], preferred_element_type=jnp.float32) + b2_ref[...]
    h2 = jnp.where(h2 > 0, h2, LEAKY_SLOPE * h2).astype(jnp.bfloat16)

    # merged head: (TM, 512) @ (512, 128)  (cols 7..127 are zero-padded)
    o = jnp.dot(h2, w3_ref[...], preferred_element_type=jnp.float32) + b3_ref[...]
    y = jax.nn.sigmoid(o)

    # lanes 0..2: (sigmoid + eps) / restrict[i]   -> fused as y*inv_r + offs
    # lanes 3.. : sigmoid                          (inv_r = 1, offs = 0)
    lane = jax.lax.broadcasted_iota(jnp.int32, (1, HEAD_PAD), 1)
    inv_r = jnp.where(
        lane == 0, 1.0 / VOLUME_RESTRICT[0],
        jnp.where(lane == 1, 1.0 / VOLUME_RESTRICT[1],
                  jnp.where(lane == 2, 1.0 / VOLUME_RESTRICT[2], 1.0)),
    ).astype(jnp.float32)
    offs = jnp.where(lane < 3, VOLUME_EPS, 0.0).astype(jnp.float32) * inv_r

    out_ref[...] = y * inv_r + offs


def volume_rotate_decoder(local_features, params, *, tm=DEFAULT_TM):
    """local_features: (..., feature_dim) float32.  Returns (volumes, rotates)."""
    *lead, d = local_features.shape
    m = math.prod(lead) if lead else 1

    w1, b1, w2, b2, w3, b3 = params
    h1_dim, h2_dim = w1.shape[1], w2.shape[1]

    # row tile: multiple of 8, no larger than the (padded) problem
    tm = min(tm, max(8, _round_up(m, 8)))
    m_pad = _round_up(m, tm)

    x2d = local_features.reshape(m, d)
    if m_pad != m:
        x2d = jnp.pad(x2d, ((0, m_pad - m), (0, 0)))
    x2d = x2d.astype(jnp.bfloat16)

    # bf16 matmul weights, f32 biases; final head zero-padded to 128 lanes
    w1b = w1.astype(jnp.bfloat16)
    w2b = w2.astype(jnp.bfloat16)
    w3p = jnp.pad(w3, ((0, 0), (0, HEAD_PAD - w3.shape[1]))).astype(jnp.bfloat16)
    b1f = b1.astype(jnp.float32)
    b2f = b2.astype(jnp.float32)
    b3p = jnp.pad(b3.astype(jnp.float32), ((0, 0), (0, HEAD_PAD - b3.shape[1])))

    grid = (m_pad // tm,)

    resident = lambda shape: pl.BlockSpec(shape, lambda i: (0, 0))
    in_specs = [
        pl.BlockSpec((tm, d), lambda i: (i, 0)),      # x tile streams over M
        resident((d, h1_dim)),                        # w1 (kept resident)
        resident((1, h1_dim)),                        # b1
        resident((h1_dim, h2_dim)),                   # w2
        resident((1, h2_dim)),                        # b2
        resident((h2_dim, HEAD_PAD)),                 # w3 (padded head)
        resident((1, HEAD_PAD)),                      # b3 (padded head)
    ]
    out_spec = pl.BlockSpec((tm, HEAD_PAD), lambda i: (i, 0))

    flops = 2 * m_pad * (d * h1_dim + h1_dim * h2_dim + h2_dim * HEAD_PAD)
    bytes_accessed = (
        2 * (d * h1_dim + h1_dim * h2_dim + h2_dim * HEAD_PAD)   # bf16 weights
        + 4 * (h1_dim + h2_dim + HEAD_PAD)                       # f32 biases
        + 2 * m_pad * d                                          # bf16 x
        + 4 * m_pad * HEAD_PAD                                   # f32 output
    )

    out2d = pl.pallas_call(
        _decoder_kernel,
        out_shape=jax.ShapeDtypeStruct((m_pad, HEAD_PAD), jnp.float32),
        grid=grid,
        in_specs=in_specs,
        out_specs=out_spec,
        compiler_params=pltpu.CompilerParams(
            dimension_semantics=("parallel",),       # megacore sharding on v7x
            vmem_limit_bytes=48 * 1024 * 1024,
        ),
        cost_estimate=pl.CostEstimate(
            flops=flops,
            transcendentals=m_pad * HEAD_PAD,
            bytes_accessed=bytes_accessed,
        ),
    )(x2d, w1b, b1f, w2b, b2f, w3p, b3p)

    out2d = out2d[:m]
    volumes = out2d[:, :3].reshape(*lead, 3)
    rotates = out2d[:, 3:7].reshape(*lead, 4)
    return volumes, rotates


def init_params(feature_dim, key):
    """Deterministic init matching nn.Linear(D,1024)->1024->512->7 shapes."""
    def linear(key, fan_in, fan_out):
        kw, kb = jax.random.split(key)
        bound = 1.0 / jnp.sqrt(jnp.float32(fan_in))
        w = jax.random.uniform(kw, (fan_in, fan_out), jnp.float32, -bound, bound)
        b = jax.random.uniform(kb, (1, fan_out), jnp.float32, -bound, bound)
        return w, b

    k1, k2, k3 = jax.random.split(key, 3)
    w1, b1 = linear(k1, feature_dim, 1024)
    w2, b2 = linear(k2, 1024, 512)
    w3, b3 = linear(k3, 512, 7)
    return (w1, b1, w2, b2, w3, b3)


def _reference(local_features, params):
    """Pure-JAX f32 reference mirroring the PyTorch forward."""
    w1, b1, w2, b2, w3, b3 = params
    h = local_features @ w1 + b1[0]
    h = jnp.where(h > 0, h, LEAKY_SLOPE * h)
    h = h @ w2 + b2[0]
    h = jnp.where(h > 0, h, LEAKY_SLOPE * h)
    out = h @ w3 + b3[0]
    vol = jax.nn.sigmoid(out[..., :3]) + VOLUME_EPS
    vol = vol / jnp.asarray(VOLUME_RESTRICT, jnp.float32)
    rot = jax.nn.sigmoid(out[..., 3:])
    return vol, rot


if __name__ == "__main__":
    feature_dim = 32
    batch, seq = 2, 8            # local_features: (batch, seq, feature_dim)

    key = jax.random.PRNGKey(0)
    k_x, k_p = jax.random.split(key)
    x = jax.random.normal(k_x, (batch, seq, feature_dim), jnp.float32)
    params = init_params(feature_dim, k_p)

    volumes, rotates = volume_rotate_decoder(x, params)
    jax.block_until_ready((volumes, rotates))

    # sanity-check against f32 pure-JAX reference (bf16 matmul inputs ->
    # relaxed tolerance; accumulation stays f32, epilogue stays f32)
    ref_vol, ref_rot = _reference(x, params)
    assert volumes.shape == (batch, seq, 3) and rotates.shape == (batch, seq, 4)
    assert jnp.allclose(volumes, ref_vol, atol=2e-2, rtol=2e-2)
    assert jnp.allclose(rotates, ref_rot, atol=2e-2, rtol=2e-2)

    print("KERNEL_OK")
</pallas_src>

<mosaic_0001>
module attributes {stable_mosaic.version = 11 : i64} {
  func.func @_decoder_kernel(%arg0: i32, %arg1: memref<16x32xbf16, #tpu.memory_space<vmem>>, %arg2: memref<32x1024xbf16, #tpu.memory_space<vmem>>, %arg3: memref<1x1024xf32, #tpu.memory_space<vmem>>, %arg4: memref<1024x512xbf16, #tpu.memory_space<vmem>>, %arg5: memref<1x512xf32, #tpu.memory_space<vmem>>, %arg6: memref<512x128xbf16, #tpu.memory_space<vmem>>, %arg7: memref<1x128xf32, #tpu.memory_space<vmem>>, %arg8: memref<16x128xf32, #tpu.memory_space<vmem>>) attributes {dimension_semantics = [#tpu.dimension_semantics<parallel>], iteration_bounds = array<i64: 1>, scalar_prefetch = 0 : i64, scratch_operands = 0 : i64, tpu.core_type = #tpu.core_type<tc>, window_params = [{transform_indices = @transform_0, window_bounds = array<i64: 16, 32>}, {pipeline_mode = #tpu.pipeline_mode<synchronous>, transform_indices = @transform_1, window_bounds = array<i64: 32, 1024>}, {pipeline_mode = #tpu.pipeline_mode<synchronous>, transform_indices = @transform_2, window_bounds = array<i64: 1, 1024>}, {pipeline_mode = #tpu.pipeline_mode<synchronous>, transform_indices = @transform_3, window_bounds = array<i64: 1024, 512>}, {pipeline_mode = #tpu.pipeline_mode<synchronous>, transform_indices = @transform_4, window_bounds = array<i64: 1, 512>}, {pipeline_mode = #tpu.pipeline_mode<synchronous>, transform_indices = @transform_5, window_bounds = array<i64: 512, 128>}, {pipeline_mode = #tpu.pipeline_mode<synchronous>, transform_indices = @transform_6, window_bounds = array<i64: 1, 128>}, {transform_indices = @transform_7, window_bounds = array<i64: 16, 128>}]} {
    %c0 = arith.constant 0 : index
    %c0_0 = arith.constant 0 : index
    %0 = vector.load %arg1[%c0, %c0_0] : memref<16x32xbf16, #tpu.memory_space<vmem>>, vector<16x32xbf16>
    %c0_1 = arith.constant 0 : index
    %c0_2 = arith.constant 0 : index
    %1 = vector.load %arg2[%c0_1, %c0_2] : memref<32x1024xbf16, #tpu.memory_space<vmem>>, vector<32x1024xbf16>
    %cst = arith.constant dense<0.000000e+00> : vector<16x1024xf32>
    %2 = tpu.matmul %0, %1, %cst {dimension_numbers = #tpu.dot_dimension_numbers<[1], [0], [0], [1], [0, 0, 1, 1], [], []>} : vector<16x32xbf16>, vector<32x1024xbf16>, vector<16x1024xf32> -> vector<16x1024xf32>
    %c0_3 = arith.constant 0 : index
    %c0_4 = arith.constant 0 : index
    %3 = vector.load %arg3[%c0_3, %c0_4] : memref<1x1024xf32, #tpu.memory_space<vmem>>, vector<1x1024xf32>
    %4 = vector.broadcast %3 : vector<1x1024xf32> to vector<16x1024xf32>
    %5 = arith.addf %2, %4 : vector<16x1024xf32>
    %cst_5 = arith.constant 0.000000e+00 : f32
    %6 = vector.broadcast %cst_5 : f32 to vector<16x1024xf32>
    %7 = arith.cmpf ogt, %5, %6 : vector<16x1024xf32>
    %cst_6 = arith.constant 0.00999999977 : f32
    %8 = vector.broadcast %cst_6 : f32 to vector<16x1024xf32>
    %9 = arith.mulf %8, %5 : vector<16x1024xf32>
    %10 = arith.select %7, %5, %9 : vector<16x1024xi1>, vector<16x1024xf32>
    %11 = arith.truncf %10 : vector<16x1024xf32> to vector<16x1024xbf16>
    %c0_7 = arith.constant 0 : index
    %c0_8 = arith.constant 0 : index
    %12 = vector.load %arg4[%c0_7, %c0_8] : memref<1024x512xbf16, #tpu.memory_space<vmem>>, vector<1024x512xbf16>
    %cst_9 = arith.constant dense<0.000000e+00> : vector<16x512xf32>
    %13 = tpu.matmul %11, %12, %cst_9 {dimension_numbers = #tpu.dot_dimension_numbers<[1], [0], [0], [1], [0, 0, 1, 1], [], []>} : vector<16x1024xbf16>, vector<1024x512xbf16>, vector<16x512xf32> -> vector<16x512xf32>
    %c0_10 = arith.constant 0 : index
    %c0_11 = arith.constant 0 : index
    %14 = vector.load %arg5[%c0_10, %c0_11] : memref<1x512xf32, #tpu.memory_space<vmem>>, vector<1x512xf32>
    %15 = vector.broadcast %14 : vector<1x512xf32> to vector<16x512xf32>
    %16 = arith.addf %13, %15 : vector<16x512xf32>
    %cst_12 = arith.constant 0.000000e+00 : f32
    %17 = vector.broadcast %cst_12 : f32 to vector<16x512xf32>
    %18 = arith.cmpf ogt, %16, %17 : vector<16x512xf32>
    %cst_13 = arith.constant 0.00999999977 : f32
    %19 = vector.broadcast %cst_13 : f32 to vector<16x512xf32>
    %20 = arith.mulf %19, %16 : vector<16x512xf32>
    %21 = arith.select %18, %16, %20 : vector<16x512xi1>, vector<16x512xf32>
    %22 = arith.truncf %21 : vector<16x512xf32> to vector<16x512xbf16>
    %c0_14 = arith.constant 0 : index
    %c0_15 = arith.constant 0 : index
    %23 = vector.load %arg6[%c0_14, %c0_15] : memref<512x128xbf16, #tpu.memory_space<vmem>>, vector<512x128xbf16>
    %cst_16 = arith.constant dense<0.000000e+00> : vector<16x128xf32>
    %24 = tpu.matmul %22, %23, %cst_16 {dimension_numbers = #tpu.dot_dimension_numbers<[1], [0], [0], [1], [0, 0, 1, 1], [], []>} : vector<16x512xbf16>, vector<512x128xbf16>, vector<16x128xf32> -> vector<16x128xf32>
    %c0_17 = arith.constant 0 : index
    %c0_18 = arith.constant 0 : index
    %25 = vector.load %arg7[%c0_17, %c0_18] : memref<1x128xf32, #tpu.memory_space<vmem>>, vector<1x128xf32>
    %26 = vector.broadcast %25 : vector<1x128xf32> to vector<16x128xf32>
    %27 = arith.addf %24, %26 : vector<16x128xf32>
    %28 = arith.negf %27 : vector<16x128xf32>
    %29 = math.exp %28 : vector<16x128xf32>
    %cst_19 = arith.constant 1.000000e+00 : f32
    %30 = vector.broadcast %cst_19 : f32 to vector<16x128xf32>
    %31 = arith.addf %30, %29 : vector<16x128xf32>
    %32 = arith.divf %30, %31 : vector<16x128xf32>
    %33 = tpu.iota {dimensions = array<i32: 1>} : vector<1x128xi32>
    %c0_i32 = arith.constant 0 : i32
    %34 = vector.broadcast %c0_i32 : i32 to vector<1x128xi32>
    %35 = arith.cmpi eq, %33, %34 : vector<1x128xi32>
    %c1_i32 = arith.constant 1 : i32
    %36 = vector.broadcast %c1_i32 : i32 to vector<1x128xi32>
    %37 = arith.cmpi eq, %33, %36 : vector<1x128xi32>
    %c2_i32 = arith.constant 2 : i32
    %38 = vector.broadcast %c2_i32 : i32 to vector<1x128xi32>
    %39 = arith.cmpi eq, %33, %38 : vector<1x128xi32>
    %cst_20 = arith.constant 0.0833333358 : f32
    %cst_21 = arith.constant 1.000000e+00 : f32
    %40 = vector.broadcast %cst_20 : f32 to vector<1x128xf32>
    %41 = vector.broadcast %cst_21 : f32 to vector<1x128xf32>
    %42 = arith.select %39, %40, %41 : vector<1x128xi1>, vector<1x128xf32>
    %cst_22 = arith.constant 1.000000e-01 : f32
    %43 = vector.broadcast %cst_22 : f32 to vector<1x128xf32>
    %44 = arith.select %37, %43, %42 : vector<1x128xi1>, vector<1x128xf32>
    %cst_23 = arith.constant 1.250000e-01 : f32
    %45 = vector.broadcast %cst_23 : f32 to vector<1x128xf32>
    %46 = arith.select %35, %45, %44 : vector<1x128xi1>, vector<1x128xf32>
    %c3_i32 = arith.constant 3 : i32
    %47 = vector.broadcast %c3_i32 : i32 to vector<1x128xi32>
    %48 = arith.cmpi slt, %33, %47 : vector<1x128xi32>
    %cst_24 = arith.constant 1.000000e-01 : f32
    %cst_25 = arith.constant 0.000000e+00 : f32
    %49 = vector.broadcast %cst_24 : f32 to vector<1x128xf32>
    %50 = vector.broadcast %cst_25 : f32 to vector<1x128xf32>
    %51 = arith.select %48, %49, %50 : vector<1x128xi1>, vector<1x128xf32>
    %52 = arith.mulf %51, %46 : vector<1x128xf32>
    %53 = vector.broadcast %46 : vector<1x128xf32> to vector<16x128xf32>
    %54 = arith.mulf %32, %53 : vector<16x128xf32>
    %55 = vector.broadcast %52 : vector<1x128xf32> to vector<16x128xf32>
    %56 = arith.addf %54, %55 : vector<16x128xf32>
    %c0_26 = arith.constant 0 : index
    %c0_27 = arith.constant 0 : index
    %57 = vector.load %arg8[%c0_26, %c0_27] : memref<16x128xf32, #tpu.memory_space<vmem>>, vector<16x128xf32>
    tpu.vector_store %arg8[%c0_26, %c0_27], %56 {strides = array<i32>} : memref<16x128xf32, #tpu.memory_space<vmem>>, vector<16x128xf32>,
    return
  }
  func.func @transform_0(%arg0: i32) -> (i32, i32) {
    %c0_i32 = arith.constant 0 : i32
    %c0_i32_0 = arith.constant 0 : i32
    return %arg0, %c0_i32 : i32, i32
  }
  func.func @transform_1(%arg0: i32) -> (i32, i32) {
    %c0_i32 = arith.constant 0 : i32
    %c0_i32_0 = arith.constant 0 : i32
    %c0_i32_1 = arith.constant 0 : i32
    return %c0_i32, %c0_i32_0 : i32, i32
  }
  func.func @transform_2(%arg0: i32) -> (i32, i32) {
    %c0_i32 = arith.constant 0 : i32
    %c0_i32_0 = arith.constant 0 : i32
    %c0_i32_1 = arith.constant 0 : i32
    return %c0_i32, %c0_i32_0 : i32, i32
  }
  func.func @transform_3(%arg0: i32) -> (i32, i32) {
    %c0_i32 = arith.constant 0 : i32
    %c0_i32_0 = arith.constant 0 : i32
    %c0_i32_1 = arith.constant 0 : i32
    return %c0_i32, %c0_i32_0 : i32, i32
  }
  func.func @transform_4(%arg0: i32) -> (i32, i32) {
    %c0_i32 = arith.constant 0 : i32
    %c0_i32_0 = arith.constant 0 : i32
    %c0_i32_1 = arith.constant 0 : i32
    return %c0_i32, %c0_i32_0 : i32, i32
  }
  func.func @transform_5(%arg0: i32) -> (i32, i32) {
    %c0_i32 = arith.constant 0 : i32
    %c0_i32_0 = arith.constant 0 : i32
    %c0_i32_1 = arith.constant 0 : i32
    return %c0_i32, %c0_i32_0 : i32, i32
  }
  func.func @transform_6(%arg0: i32) -> (i32, i32) {
    %c0_i32 = arith.constant 0 : i32
    %c0_i32_0 = arith.constant 0 : i32
    %c0_i32_1 = arith.constant 0 : i32
    return %c0_i32, %c0_i32_0 : i32, i32
  }
  func.func @transform_7(%arg0: i32) -> (i32, i32) {
    %c0_i32 = arith.constant 0 : i32
    %c0_i32_0 = arith.constant 0 : i32
    return %arg0, %c0_i32 : i32, i32
  }
}

</mosaic_0001>

<bundles_post_ra>
// kernel: tpu_custom_call.1
= control target key start
LH: loop header
LB: loop body
LE: loop exit
PB: predicated region body
PF: predicated region fallthrough
CT: control target
= control target key end

     0   :  { %12 = vsyncpa [#allocation3], 0  ;;  %s3973_s0 = inlined_call_operand.hbm [shape: bf16[16,32], index: 0, kind: input, shape index: {}]   ;;  %s3974_s1 = inlined_call_operand.hbm [shape: bf16[32,1024], index: 1, kind: input, shape index: {}]   ;;  %s3975_s2 = inlined_call_operand.hbm [shape: f32[1,1024], index: 2, kind: input, shape index: {}]   ;;  %s3976_s3 = inlined_call_operand.hbm [shape: bf16[1024,512], index: 3, kind: input, shape index: {}]   ;;  %s3977_s4 = inlined_call_operand.vmem [shape: f32[1,512], index: 4, kind: input, shape index: {}]   ;;  %s3978_s5 = inlined_call_operand.hbm [shape: bf16[512,128], index: 5, kind: input, shape index: {}]   ;;  %s3979_s6 = inlined_call_operand.vmem [shape: f32[1,128], index: 6, kind: input, shape index: {}]   ;;  %s3980_s7 = inlined_call_operand.hbm [shape: f32[16,128], index: 7, kind: output, shape index: {}]  }
   0x1   :  { %13 = vsyncpa [#allocation6], 0 }
   0x2   :  { %14 = vsyncpa [#allocation9], 0 }
   0x3   :  { %15 = vsyncpa [#allocation4], 0  ;;  %s3764_s24 = smov [#allocation5]   ;;  %s3624_s28 = scalar_lea.hbm %s3974_s1, 2048 }
   0x4   :  { %s33_s25 = sshll.u32 %s3764_s24, 4  ;;  %p3625_p0 = scmp.ne.s32.totalorder %s3974_s1, %s3624_s28  ;;  %s34_s25 = int_to_ptr.vmem [resolvable:$true] %s33_s25 }
   0x5   :  { %p3628_p1 = scmp.lt.u32.totalorder %s3624_s28, %s3974_s1 }
   0x7   :  { %p3630_p2 = pnand %p3628_p1, %p3625_p0 }
   0x9   :  { %3633 = shalt.err (!%p3630_p2)
}
   0xa   :  { %s3634_s10 = scalar_lea.vmem %s34_s25, 2048  ;;  %p3639_p4 = scmp.lt.s32.totalorder %s34_s25, %s34_s25 }
   0xb   :  { %p3635_p3 = scmp.ne.s32.totalorder %s34_s25, %s3634_s10  ;;  %p3640_p5 = scmp.lt.s32.totalorder %s3634_s10, %s3634_s10 }
   0xd   :  { %p3641_p6 = por %p3640_p5, %p3639_p4 }
   0xf   :  { %p3642_p7 = pnand %p3641_p6, %p3635_p3 }
  0x11   :  { %3645 = shalt.err (!%p3642_p7)
}
  0x12   :  { %s3765_s11 = smov 512   ;;  %s3766_s12 = smov 32  }
  0x13   :  { %39 = dma.hbm_to_vmem [thread:$0]  %s3974_s1, 2048, %s34_s25, [#allocation6], %s3765_s11, %s3765_s11, %s3766_s12  }
  0x14   :  { %s3767_s15 = smov [#allocation8]   ;;  %s3646_s19 = scalar_lea.hbm %s3976_s3, 32768 }
  0x15   :  { %s55_s16 = sshll.u32 %s3767_s15, 4  ;;  %p3647_p8 = scmp.ne.s32.totalorder %s3976_s3, %s3646_s19  ;;  %s56_s16 = int_to_ptr.vmem [resolvable:$true] %s55_s16 }
  0x16   :  { %p3650_p9 = scmp.lt.u32.totalorder %s3646_s19, %s3976_s3 }
  0x18   :  { %p3652_p10 = pnand %p3650_p9, %p3647_p8 }
  0x1a   :  { %3655 = shalt.err (!%p3652_p10)
}
  0x1b   :  { %s3656_s24 = scalar_lea.vmem %s56_s16, 32768  ;;  %p3661_p12 = scmp.lt.s32.totalorder %s56_s16, %s56_s16 }
  0x1c   :  { %p3657_p11 = scmp.ne.s32.totalorder %s56_s16, %s3656_s24  ;;  %p3662_p13 = scmp.lt.s32.totalorder %s3656_s24, %s3656_s24 }
  0x1e   :  { %p3663_p0 = por %p3662_p13, %p3661_p12 }
  0x20   :  { %p3664_p1 = pnand %p3663_p0, %p3657_p11 }
  0x22   :  { %3667 = shalt.err (!%p3664_p1)
}
  0x23   :  { %s3768_s1 = smov 256   ;;  %s3769_s25 = smov 16  }
  0x24   :  { %61 = dma.hbm_to_vmem [thread:$0]  %s3976_s3, 32768, %s56_s16, [#allocation9], %s3768_s1, %s3768_s1, %s3769_s25  }
  0x25   :  { %s3770_s28 = smov [#allocation2]   ;;  %s3668_s9 = scalar_lea.hbm %s3973_s0, 128 }
  0x26   :  { %s21_s29 = sshll.u32 %s3770_s28, 4  ;;  %p3669_p2 = scmp.ne.s32.totalorder %s3973_s0, %s3668_s9  ;;  %s22_s29 = int_to_ptr.vmem [resolvable:$true] %s21_s29 }
  0x27   :  { %p3672_p3 = scmp.lt.u32.totalorder %s3668_s9, %s3973_s0 }
  0x29   :  { %p3674_p4 = pnand %p3672_p3, %p3669_p2 }
  0x2b   :  { %3677 = shalt.err (!%p3674_p4)
}
  0x2c   :  { %s3678_s14 = scalar_lea.vmem %s22_s29, 128  ;;  %p3683_p6 = scmp.lt.s32.totalorder %s22_s29, %s22_s29 }
  0x2d   :  { %p3679_p5 = scmp.ne.s32.totalorder %s22_s29, %s3678_s14  ;;  %p3684_p7 = scmp.lt.s32.totalorder %s3678_s14, %s3678_s14 }
  0x2f   :  { %p3685_p8 = por %p3684_p7, %p3683_p6 }
  0x31   :  { %p3686_p9 = pnand %p3685_p8, %p3679_p5 }
  0x33   :  { %3689 = shalt.err (!%p3686_p9)
}
  0x34   :  { %s3771_s3 = smov 64   ;;  %s3772_s15 = smov 4  }
  0x35   :  { %27 = dma.hbm_to_vmem [thread:$0]  %s3973_s0, 128, %s22_s29, [#allocation3], %s3771_s3, %s3771_s3, %s3772_s15  }
  0x36   :  { %s3773_s18 = smov [#allocation7]   ;;  %s3774_s20 = smov [#allocation10]  }
  0x37   :  { %s46_s19 = sshll.u32 %s3773_s18, 4  ;;  %s69_s21 = sshll.u32 %s3774_s20, 4  ;;  %s47_s19 = int_to_ptr.vmem [resolvable:$true] %s46_s19  ;;  %s70_s21 = int_to_ptr.vmem [resolvable:$true] %s69_s21 }
  0x38   :  { %s3690_s24 = scalar_lea.hbm %s3975_s2, 128 }
  0x39   :  { %p3691_p10 = scmp.ne.s32.totalorder %s3975_s2, %s3690_s24  ;;  %p3694_p11 = scmp.lt.u32.totalorder %s3690_s24, %s3975_s2 }
  0x3b   :  { %p3696_p12 = pnand %p3694_p11, %p3691_p10 }
  0x3d   :  { %3699 = shalt.err (!%p3696_p12)
}
  0x3e   :  { %s3700_s0 = scalar_lea.vmem %s47_s19, 128  ;;  %p3705_p0 = scmp.lt.s32.totalorder %s47_s19, %s47_s19 }
  0x3f   :  { %p3701_p13 = scmp.ne.s32.totalorder %s47_s19, %s3700_s0  ;;  %p3706_p1 = scmp.lt.s32.totalorder %s3700_s0, %s3700_s0 }
  0x41   :  { %p3707_p2 = por %p3706_p1, %p3705_p0 }
  0x43   :  { %p3708_p3 = pnand %p3707_p2, %p3701_p13 }
  0x45   :  { %3711 = shalt.err (!%p3708_p3)
}
  0x46   :  { %49 = dma.hbm_to_vmem [thread:$0]  %s3975_s2, 128, %s47_s19, [#allocation6]  }
  0x47   :  { %s3712_s9 = scalar_lea.hbm %s3978_s5, 4096 }
  0x48   :  { %p3713_p4 = scmp.ne.s32.totalorder %s3978_s5, %s3712_s9  ;;  %p3716_p5 = scmp.lt.u32.totalorder %s3712_s9, %s3978_s5 }
  0x4a   :  { %p3718_p6 = pnand %p3716_p5, %p3713_p4 }
  0x4c   :  { %3721 = shalt.err (!%p3718_p6)
}
  0x4d   :  { %s3722_s14 = scalar_lea.vmem %s70_s21, 4096  ;;  %p3727_p8 = scmp.lt.s32.totalorder %s70_s21, %s70_s21 }
  0x4e   :  { %p3723_p7 = scmp.ne.s32.totalorder %s70_s21, %s3722_s14  ;;  %p3728_p9 = scmp.lt.s32.totalorder %s3722_s14, %s3722_s14 }
  0x50   :  { %p3729_p10 = por %p3728_p9, %p3727_p8 }
  0x52   :  { %p3730_p11 = pnand %p3729_p10, %p3723_p7 }
  0x54   :  { %3733 = shalt.err (!%p3730_p11)
}
  0x55   :  { %75 = dma.hbm_to_vmem [thread:$0]  %s3978_s5, 4096, %s70_s21, [#allocation9], %s3771_s3, %s3771_s3, %s3772_s15  }
  0x56   :  { %3756 = dma.done.wait [#allocation3], 128  }
  0x57   :  { %3757 = vsyncadd [#allocation3], 4294967168 }
  0x58   :  { %3758 = dma.done.wait [#allocation6], 2176  }
  0x59   :  { %3759 = vsyncadd [#allocation6], 4294965120 }
  0x5a   :  { %3760 = dma.done.wait [#allocation9], 36864  }
  0x5b   :  { %3761 = vsyncadd [#allocation9], 4294930432  ;;  %v3775_v0 = vmov 0   ;;  %v96_v1 = vld [vmem:[#allocation5] sm:$0xff]  ;;  %v97_v8 = vld [vmem:[#allocation5 + $0x8] sm:$0xff]  ;;  %vm239_vm0 = vcmask 261120  }
  0x5c   :  { %275 = vmatprep.mubr.bf16.mxu0 %v3775_v0  ;;  %318 = vmatprep.mubr.bf16.mxu1 %v3775_v0  ;;  %v100_v2 = vld [vmem:[#allocation5 + $0x20] sm:$0xff]  ;;  %v101_v9 = vld [vmem:[#allocation5 + $0x28] sm:$0xff]  ;;  %v98_v14 = vld [vmem:[#allocation5 + $0x10] sm:$0xff] }
  0x5d   :  { %v104_v3 = vld [vmem:[#allocation5 + $0x40] sm:$0xff]  ;;  %v2796_v4 = vcombine.high %v96_v1, %v100_v2  ;;  %v2795_v5 = vcombine.low %v96_v1, %v100_v2  ;;  %v2798_v10 = vcombine.high %v97_v8, %v101_v9  ;;  %v2797_v11 = vcombine.low %v97_v8, %v101_v9  ;;  %v105_v12 = vld [vmem:[#allocation5 + $0x48] sm:$0xff]  ;;  %v102_v17 = vld [vmem:[#allocation5 + $0x30] sm:$0xff] }
  0x5e   :  { %v108_v6 = vld [vmem:[#allocation5 + $0x60] sm:$0xff]  ;;  %v109_v13 = vld [vmem:[#allocation5 + $0x68] sm:$0xff]  ;;  %v2800_v18 = vcombine.high %v98_v14, %v102_v17  ;;  %v106_v19 = vld [vmem:[#allocation5 + $0x50] sm:$0xff]  ;;  %v2799_v26 = vcombine.low %v98_v14, %v102_v17 }
  0x5f   :  { %v2804_v7 = vcombine.high %v104_v3, %v108_v6  ;;  %243 = vmatprep.subr.bf16.mxu0 %v2796_v4  ;;  %v2803_v15 = vcombine.low %v104_v3, %v108_v6  ;;  %v2806_v16 = vcombine.high %v105_v12, %v109_v13  ;;  %286 = vmatprep.subr.bf16.mxu1 %v2798_v10  ;;  %v99_v20 = vld [vmem:[#allocation5 + $0x18] sm:$0xff]  ;;  %v110_v23 = vld [vmem:[#allocation5 + $0x70] sm:$0xff] }
  0x60   :  { %244 = vmatpush1.bf16.msra.mxu0 %v2795_v5  ;;  %v103_v21 = vld [vmem:[#allocation5 + $0x38] sm:$0xff]  ;;  %287 = vmatpush1.bf16.msra.mxu1 %v2797_v11  ;;  %v2805_v22 = vcombine.low %v105_v12, %v109_v13  ;;  %v2808_v29 = vcombine.high %v106_v19, %v110_v23  ;;  %v2807_v32 = vcombine.low %v106_v19, %v110_v23  ;;  %v3205_v35 = vld [vmem:[#allocation8 + $0xc] ss:$16 sps:$4 sm:$0xff]   ;;  %v3203_v38 = vld [vmem:[#allocation8 + $0x8] ss:$16 sps:$4 sm:$0xff]  }
  0x61   :  { %245 = vmatprep.subr.bf16.mxu0 %v2804_v7  ;;  %v3199_v24 = vld [vmem:[#allocation2] sm:$0xff]   ;;  %288 = vmatprep.subr.bf16.mxu1 %v2806_v16  ;;  %v2802_v25 = vcombine.high %v99_v20, %v103_v21  ;;  %v2801_v30 = vcombine.low %v99_v20, %v103_v21  ;;  %v3211_v39 = vld [vmem:[#allocation8 + $0x2c] ss:$16 sps:$4 sm:$0xff]   ;;  %v3209_v42 = vld [vmem:[#allocation8 + $0x28] ss:$16 sps:$4 sm:$0xff]  }
  0x62   :  { %v107_v27 = vld [vmem:[#allocation5 + $0x58] sm:$0xff]  ;;  %v3217_v43 = vld [vmem:[#allocation8 + $0x4c] ss:$16 sps:$4 sm:$0xff]   ;;  %v3215_v46 = vld [vmem:[#allocation8 + $0x48] ss:$16 sps:$4 sm:$0xff]  }
  0x63   :  { %v111_v28 = vld [vmem:[#allocation5 + $0x78] sm:$0xff]  ;;  %v3223_v47 = vld [vmem:[#allocation8 + $0x6c] ss:$16 sps:$4 sm:$0xff]   ;;  %v3221_v50 = vld [vmem:[#allocation8 + $0x68] ss:$16 sps:$4 sm:$0xff]  }
  0x64   :  { %246 = vmatpush1.bf16.msra.mxu0 %v2803_v15  ;;  %289 = vmatpush1.bf16.msra.mxu1 %v2805_v22  ;;  %v2810_v31 = vcombine.high %v107_v27, %v111_v28  ;;  %v3202_v33 = vld [vmem:[#allocation8 + $0x4] ss:$16 sps:$4 sm:$0xff]   ;;  %v2809_v34 = vcombine.low %v107_v27, %v111_v28  ;;  %v3200_v36 = vld [vmem:[#allocation8] ss:$16 sps:$4 sm:$0xff]   ;;  %v3229_v51 = vld [vmem:[#allocation8 + $0x8c] ss:$16 sps:$4 sm:$0xff]  }
  0x65   :  { %329 = vmatprep.subr.bf16.mxu0 %v2800_v18  ;;  %372 = vmatprep.subr.bf16.mxu1 %v2802_v25  ;;  %v3208_v37 = vld [vmem:[#allocation8 + $0x24] ss:$16 sps:$4 sm:$0xff]   ;;  %v3206_v40 = vld [vmem:[#allocation8 + $0x20] ss:$16 sps:$4 sm:$0xff]   ;;  %v3227_v54 = vld [vmem:[#allocation8 + $0x88] ss:$16 sps:$4 sm:$0xff]  }
  0x66   :  { %v3214_v41 = vld [vmem:[#allocation8 + $0x44] ss:$16 sps:$4 sm:$0xff]   ;;  %v3212_v44 = vld [vmem:[#allocation8 + $0x40] ss:$16 sps:$4 sm:$0xff]   ;;  %v3235_v55 = vld [vmem:[#allocation8 + $0xac] ss:$16 sps:$4 sm:$0xff]  }
  0x67   :  { %2811 = vmatmul.mubr.msk.bf16.vlgmr.msra.gmra.mrb[0].mxu0 %vm239_vm0, %v3199_v24  ;;  %2812 = vmatmul.mubr.msk.bf16.vlgmr.msra.gmra.mrb[0].mxu1 %vm239_vm0, %v3199_v24  ;;  %v3220_v45 = vld [vmem:[#allocation8 + $0x64] ss:$16 sps:$4 sm:$0xff]   ;;  %v3218_v48 = vld [vmem:[#allocation8 + $0x60] ss:$16 sps:$4 sm:$0xff]   ;;  %v3233_v58 = vld [vmem:[#allocation8 + $0xa8] ss:$16 sps:$4 sm:$0xff]  }
  0x68   :  { %330 = vmatpush1.bf16.msra.mxu0 %v2799_v26  ;;  %361 = vmatprep.mubr.bf16.mxu0 %v3775_v0  ;;  %v3226_v49 = vld [vmem:[#allocation8 + $0x84] ss:$16 sps:$4 sm:$0xff]   ;;  %v3224_v52 = vld [vmem:[#allocation8 + $0x80] ss:$16 sps:$4 sm:$0xff]   ;;  %v3241_v59 = vld [vmem:[#allocation8 + $0xcc] ss:$16 sps:$4 sm:$0xff]  }
  0x69   :  { %331 = vmatprep.subr.bf16.mxu0 %v2808_v29  ;;  %373 = vmatpush1.bf16.msra.mxu1 %v2801_v30  ;;  %v3232_v53 = vld [vmem:[#allocation8 + $0xa4] ss:$16 sps:$4 sm:$0xff]   ;;  %v3230_v56 = vld [vmem:[#allocation8 + $0xa0] ss:$16 sps:$4 sm:$0xff]   ;;  %v3239_v62 = vld [vmem:[#allocation8 + $0xc8] ss:$16 sps:$4 sm:$0xff]  }
  0x6a   :  { %404 = vmatprep.mubr.bf16.mxu1 %v3775_v0  ;;  %374 = vmatprep.subr.bf16.mxu1 %v2810_v31  ;;  %v3238_v57 = vld [vmem:[#allocation8 + $0xc4] ss:$16 sps:$4 sm:$0xff]   ;;  %v3236_v60 = vld [vmem:[#allocation8 + $0xc0] ss:$16 sps:$4 sm:$0xff]   ;;  %v3247_v0 = vld [vmem:[#allocation8 + $0xec] ss:$16 sps:$4 sm:$0xff]  }
  0x6b   :  { %v3244_v61 = vld [vmem:[#allocation8 + $0xe4] ss:$16 sps:$4 sm:$0xff]   ;;  %v3242_v63 = vld [vmem:[#allocation8 + $0xe0] ss:$16 sps:$4 sm:$0xff]   ;;  %v3245_v2 = vld [vmem:[#allocation8 + $0xe8] ss:$16 sps:$4 sm:$0xff]  }
  0x6c   :  { %332 = vmatpush1.bf16.msra.mxu0 %v2807_v32  ;;  %v3250_v1 = vld [vmem:[#allocation8 + $0x104] ss:$16 sps:$4 sm:$0xff]   ;;  %v3253_v3 = vld [vmem:[#allocation8 + $0x10c] ss:$16 sps:$4 sm:$0xff]   ;;  %v3248_v4 = vld [vmem:[#allocation8 + $0x100] ss:$16 sps:$4 sm:$0xff]  }
  0x6d   :  { %2029 = vmatprep.subr.bf16.mxu0 %v3202_v33  ;;  %375 = vmatpush1.bf16.msra.mxu1 %v2809_v34  ;;  %v3256_v5 = vld [vmem:[#allocation8 + $0x124] ss:$16 sps:$4 sm:$0xff]   ;;  %v3251_v6 = vld [vmem:[#allocation8 + $0x108] ss:$16 sps:$4 sm:$0xff]   ;;  %v3259_v7 = vld [vmem:[#allocation8 + $0x12c] ss:$16 sps:$4 sm:$0xff]  }
  0x6e   :  { %2201 = vmatprep.subr.bf16.mxu1 %v3205_v35  ;;  %v3254_v8 = vld [vmem:[#allocation8 + $0x120] ss:$16 sps:$4 sm:$0xff]   ;;  %v3262_v9 = vld [vmem:[#allocation8 + $0x144] ss:$16 sps:$4 sm:$0xff]   ;;  %v3257_v10 = vld [vmem:[#allocation8 + $0x128] ss:$16 sps:$4 sm:$0xff]  }
  0x6f   :  { %2813 = vmatmul.mubr.msk.bf16.vlgmr.msra.gmra.mrb[4].mxu0 %vm239_vm0, %v3199_v24  ;;  %v3265_v11 = vld [vmem:[#allocation8 + $0x14c] ss:$16 sps:$4 sm:$0xff]   ;;  %v3260_v12 = vld [vmem:[#allocation8 + $0x140] ss:$16 sps:$4 sm:$0xff]   ;;  %v3268_v13 = vld [vmem:[#allocation8 + $0x164] ss:$16 sps:$4 sm:$0xff]  }
  0x70   :  { %2030 = vmatpush1.bf16.msra.mxu0 %v3200_v36  ;;  %2814 = vmatmul.mubr.msk.bf16.vlgmr.msra.gmra.mrb[4].mxu1 %vm239_vm0, %v3199_v24  ;;  %v3263_v14 = vld [vmem:[#allocation8 + $0x148] ss:$16 sps:$4 sm:$0xff]   ;;  %v3271_v15 = vld [vmem:[#allocation8 + $0x16c] ss:$16 sps:$4 sm:$0xff]   ;;  %v3266_v16 = vld [vmem:[#allocation8 + $0x160] ss:$16 sps:$4 sm:$0xff]   ;;  %v114_v36 = vlaneseq }
  0x71   :  { %2031 = vmatprep.subr.bf16.mxu0 %v3208_v37  ;;  %2202 = vmatpush1.bf16.msra.mxu1 %v3203_v38  ;;  %v3274_v17 = vld [vmem:[#allocation8 + $0x184] ss:$16 sps:$4 sm:$0xff]   ;;  %v3269_v18 = vld [vmem:[#allocation8 + $0x168] ss:$16 sps:$4 sm:$0xff]   ;;  %v3277_v19 = vld [vmem:[#allocation8 + $0x18c] ss:$16 sps:$4 sm:$0xff]  }
  0x72   :  { %2203 = vmatprep.subr.bf16.mxu1 %v3211_v39  ;;  %v3272_v20 = vld [vmem:[#allocation8 + $0x180] ss:$16 sps:$4 sm:$0xff]   ;;  %v3280_v21 = vld [vmem:[#allocation8 + $0x1a4] ss:$16 sps:$4 sm:$0xff]   ;;  %v3275_v22 = vld [vmem:[#allocation8 + $0x188] ss:$16 sps:$4 sm:$0xff]  }
  0x73   :  { %v3283_v23 = vld [vmem:[#allocation8 + $0x1ac] ss:$16 sps:$4 sm:$0xff]   ;;  %v3278_v24 = vld [vmem:[#allocation8 + $0x1a0] ss:$16 sps:$4 sm:$0xff]   ;;  %v3281_v25 = vld [vmem:[#allocation8 + $0x1a8] ss:$16 sps:$4 sm:$0xff]  }
  0x74   :  { %2032 = vmatpush1.bf16.msra.mxu0 %v3206_v40  ;;  %v3286_v26 = vld [vmem:[#allocation8 + $0x1c4] ss:$16 sps:$4 sm:$0xff]   ;;  %v3289_v27 = vld [vmem:[#allocation8 + $0x1cc] ss:$16 sps:$4 sm:$0xff]   ;;  %v3284_v28 = vld [vmem:[#allocation8 + $0x1c0] ss:$16 sps:$4 sm:$0xff]  }
  0x75   :  { %2033 = vmatprep.subr.bf16.mxu0 %v3214_v41  ;;  %2204 = vmatpush1.bf16.msra.mxu1 %v3209_v42  ;;  %v3287_v29 = vld [vmem:[#allocation8 + $0x1c8] ss:$16 sps:$4 sm:$0xff]   ;;  %v3292_v30 = vld [vmem:[#allocation8 + $0x1e4] ss:$16 sps:$4 sm:$0xff]   ;;  %v3295_v31 = vld [vmem:[#allocation8 + $0x1ec] ss:$16 sps:$4 sm:$0xff]  }
  0x76   :  { %2205 = vmatprep.subr.bf16.mxu1 %v3217_v43  ;;  %v3290_v32 = vld [vmem:[#allocation8 + $0x1e0] ss:$16 sps:$4 sm:$0xff]   ;;  %v3293_v33 = vld [vmem:[#allocation8 + $0x1e8] ss:$16 sps:$4 sm:$0xff]   ;;  %v3298_v34 = vld [vmem:[#allocation8 + $0x204] ss:$16 sps:$4 sm:$0xff]  }
  0x77   :  { %v3301_v35 = vld [vmem:[#allocation8 + $0x20c] ss:$16 sps:$4 sm:$0xff]   ;;  %v3892_v37 = vshrl.u32 %v114_v36, 7 }
  0x78   :  { %2034 = vmatpush1.bf16.msra.mxu0 %v3212_v44  ;;  %v3895_v39 = vld [vmem:[#allocation7] sm:$0xff] }
  0x79   :  { %2035 = vmatprep.subr.bf16.mxu0 %v3220_v45  ;;  %2206 = vmatpush1.bf16.msra.mxu1 %v3215_v46  ;;  %v116_v38 = vsub.s32 0, %v3892_v37  ;;  %v120_v40 = vsub.s32 1, %v3892_v37  ;;  %v124_v41 = vsub.s32 2, %v3892_v37  ;;  %v128_v42 = vsub.s32 3, %v3892_v37 }
  0x7a   :  { %2207 = vmatprep.subr.bf16.mxu1 %v3223_v47  ;;  %v132_v45 = vsub.s32 4, %v3892_v37  ;;  %v136_v46 = vsub.s32 5, %v3892_v37 }
  0x7b   :  { %v117_v43 = vrot.slane %v3895_v39, %v116_v38  ;;  %v121_v44 = vrot.slane %v3895_v39, %v120_v40  ;;  %v125_v47 = vrot.slane %v3895_v39, %v124_v41 }
  0x7c   :  { %2036 = vmatpush1.bf16.msra.mxu0 %v3218_v48 }
  0x7d   :  { %2037 = vmatprep.subr.bf16.mxu0 %v3226_v49  ;;  %2208 = vmatpush1.bf16.msra.mxu1 %v3221_v50  ;;  %v129_v49 = vrot.slane %v3895_v39, %v128_v42 }
  0x7e   :  { %2209 = vmatprep.subr.bf16.mxu1 %v3229_v51 }
  0x80   :  { %2038 = vmatpush1.bf16.msra.mxu0 %v3224_v52 }
  0x81   :  { %2039 = vmatprep.subr.bf16.mxu0 %v3232_v53  ;;  %2210 = vmatpush1.bf16.msra.mxu1 %v3227_v54 }
  0x82   :  { %2211 = vmatprep.subr.bf16.mxu1 %v3235_v55  ;;  %v133_v55 = vrot.slane %v3895_v39, %v132_v45  ;;  %v3310_v45 = vld [vmem:[#allocation8 + $0x244] ss:$16 sps:$4 sm:$0xff]  }
  0x84   :  { %2040 = vmatpush1.bf16.msra.mxu0 %v3230_v56  ;;  %v3916_v56 = vrot.slane %v3895_v39, %v136_v46  ;;  %v3313_v46 = vld [vmem:[#allocation8 + $0x24c] ss:$16 sps:$4 sm:$0xff]  }
  0x85   :  { %2041 = vmatprep.subr.bf16.mxu0 %v3238_v57  ;;  %2212 = vmatpush1.bf16.msra.mxu1 %v3233_v58 }
  0x86   :  { %2213 = vmatprep.subr.bf16.mxu1 %v3241_v59 }
  0x88   :  { %2042 = vmatpush1.bf16.msra.mxu0 %v3236_v60 }
  0x89   :  { %2043 = vmatprep.subr.bf16.mxu0 %v3244_v61  ;;  %2214 = vmatpush1.bf16.msra.mxu1 %v3239_v62 }
  0x8a   :  { %2215 = vmatprep.subr.bf16.mxu1 %v3247_v0 }
  0x8c   :  { %2044 = vmatpush1.bf16.msra.mxu0 %v3242_v63 }
  0x8d   :  { %2045 = vmatprep.subr.bf16.mxu0 %v3250_v1  ;;  %2216 = vmatpush1.bf16.msra.mxu1 %v3245_v2 }
  0x8e   :  { %2217 = vmatprep.subr.bf16.mxu1 %v3253_v3 }
  0x90   :  { %2046 = vmatpush1.bf16.msra.mxu0 %v3248_v4 }
  0x91   :  { %2047 = vmatprep.subr.bf16.mxu0 %v3256_v5  ;;  %2218 = vmatpush1.bf16.msra.mxu1 %v3251_v6 }
  0x92   :  { %2219 = vmatprep.subr.bf16.mxu1 %v3259_v7 }
  0x94   :  { %2048 = vmatpush1.bf16.msra.mxu0 %v3254_v8 }
  0x95   :  { %2049 = vmatprep.subr.bf16.mxu0 %v3262_v9  ;;  %2220 = vmatpush1.bf16.msra.mxu1 %v3257_v10 }
  0x96   :  { %2221 = vmatprep.subr.bf16.mxu1 %v3265_v11 }
  0x98   :  { %2050 = vmatpush1.bf16.msra.mxu0 %v3260_v12 }
  0x99   :  { %2051 = vmatprep.subr.bf16.mxu0 %v3268_v13  ;;  %2222 = vmatpush1.bf16.msra.mxu1 %v3263_v14  ;;  %v3296_v13 = vld [vmem:[#allocation8 + $0x200] ss:$16 sps:$4 sm:$0xff]   ;;  %v3299_v14 = vld [vmem:[#allocation8 + $0x208] ss:$16 sps:$4 sm:$0xff]  }
  0x9a   :  { %2223 = vmatprep.subr.bf16.mxu1 %v3271_v15 }
  0x9c   :  { %2052 = vmatpush1.bf16.msra.mxu0 %v3266_v16 }
  0x9d   :  { %2053 = vmatprep.subr.bf16.mxu0 %v3274_v17  ;;  %2224 = vmatpush1.bf16.msra.mxu1 %v3269_v18 }
  0x9e   :  { %2225 = vmatprep.subr.bf16.mxu1 %v3277_v19  ;;  %v3304_v19 = vld [vmem:[#allocation8 + $0x224] ss:$16 sps:$4 sm:$0xff]  }
  0xa0   :  { %2054 = vmatpush1.bf16.msra.mxu0 %v3272_v20 }
  0xa1   :  { %2055 = vmatprep.subr.bf16.mxu0 %v3280_v21  ;;  %2226 = vmatpush1.bf16.msra.mxu1 %v3275_v22 }
  0xa2   :  { %2227 = vmatprep.subr.bf16.mxu1 %v3283_v23  ;;  %v3307_v23 = vld [vmem:[#allocation8 + $0x22c] ss:$16 sps:$4 sm:$0xff]  }
  0xa4   :  { %2056 = vmatpush1.bf16.msra.mxu0 %v3278_v24 }
  0xa5   :  { %2228 = vmatpush1.bf16.msra.mxu1 %v3281_v25  ;;  %2057 = vmatprep.subr.bf16.mxu0 %v3286_v26 }
  0xa6   :  { %2229 = vmatprep.subr.bf16.mxu1 %v3289_v27 }
  0xa8   :  { %2058 = vmatpush1.bf16.msra.mxu0 %v3284_v28 }
  0xa9   :  { %2230 = vmatpush1.bf16.msra.mxu1 %v3287_v29  ;;  %2059 = vmatprep.subr.bf16.mxu0 %v3292_v30 }
  0xaa   :  { %2231 = vmatprep.subr.bf16.mxu1 %v3295_v31  ;;  %v3302_v31 = vld [vmem:[#allocation8 + $0x220] ss:$16 sps:$4 sm:$0xff]  }
  0xac   :  { %2060 = vmatpush1.bf16.msra.mxu0 %v3290_v32 }
  0xad   :  { %2232 = vmatpush1.bf16.msra.mxu1 %v3293_v33  ;;  %2072 = vmatprep.subr.bf16.mxu0 %v3298_v34 }
  0xae   :  { %2244 = vmatprep.subr.bf16.mxu1 %v3301_v35  ;;  %v3305_v35 = vld [vmem:[#allocation8 + $0x228] ss:$16 sps:$4 sm:$0xff]  }
 0x13a   :  { %v277_v48 = vpop.f32.mrb[0].mxu0  ;;  %v320_v54 = vpop.f32.mrb[0].mxu1 }
 0x13b   :  { %v278_v50 = vadd.f32 %v277_v48, %v117_v43  ;;  %v279_v51 = vpop.f32.mrb[1].mxu0  ;;  %v321_v60 = vadd.f32 %v320_v54, %v125_v47  ;;  %v322_v61 = vpop.f32.mrb[1].mxu1  ;;  %v3311_v54 = vld [vmem:[#allocation8 + $0x248] ss:$16 sps:$4 sm:$0xff]  }
 0x13c   :  { %v280_v52 = vadd.f32 %v279_v51, %v121_v44  ;;  %v281_v53 = vpop.f32.mrb[2].mxu0  ;;  %v323_v0 = vadd.f32 %v322_v61, %v129_v49  ;;  %v324_v1 = vpop.f32.mrb[2].mxu1  ;;  %v3317_v61 = vld [vmem:[#allocation8 + $0x268] ss:$16 sps:$4 sm:$0xff]  }
 0x13d   :  { %vm415_vm1 = vcmp.gt.f32.partialorder %v278_v50, 0.0  ;;  %v431_v57 = vmul.f32 0.01, %v278_v50  ;;  %v282_v58 = vadd.f32 %v281_v53, %v117_v43  ;;  %v283_v59 = vpop.f32.mrb[3].mxu0  ;;  %vm417_vm4 = vcmp.gt.f32.partialorder %v321_v60, 0.0  ;;  %v326_v4 = vpop.f32.mrb[3].mxu1 }
 0x13e   :  { %vm416_vm2 = vcmp.gt.f32.partialorder %v280_v52, 0.0  ;;  %v432_v62 = vmul.f32 0.01, %v280_v52  ;;  %v284_v63 = vadd.f32 %v283_v59, %v121_v44  ;;  %v433_v7 = vmul.f32 0.01, %v321_v60 }
 0x13f   :  { %v447_v2 = vsel %vm415_vm1, %v278_v50, %v431_v57  ;;  %vm423_vm3 = vcmp.gt.f32.partialorder %v282_v58, 0.0  ;;  %v439_v3 = vmul.f32 0.01, %v282_v58  ;;  %vm418_vm6 = vcmp.gt.f32.partialorder %v323_v0, 0.0  ;;  %v3308_v53 = vld [vmem:[#allocation8 + $0x240] ss:$16 sps:$4 sm:$0xff]  }
 0x140   :  { %vm424_vm5 = vcmp.gt.f32.partialorder %v284_v63, 0.0  ;;  %v440_v5 = vmul.f32 0.01, %v284_v63  ;;  %v448_v6 = vsel %vm416_vm2, %v280_v52, %v432_v62  ;;  %v434_v9 = vmul.f32 0.01, %v323_v0 }
 0x141   :  { %v455_v8 = vsel %vm423_vm3, %v282_v58, %v439_v3  ;;  %v325_v10 = vadd.f32 %v324_v1, %v125_v47  ;;  %v449_v15 = vsel %vm417_vm4, %v321_v60, %v433_v7  ;;  %v327_v16 = vadd.f32 %v326_v4, %v129_v49  ;;  %v3316_v57 = vld [vmem:[#allocation8 + $0x264] ss:$16 sps:$4 sm:$0xff]   ;;  %v3319_v58 = vld [vmem:[#allocation8 + $0x26c] ss:$16 sps:$4 sm:$0xff]   ;;  %v3323_v1 = vld [vmem:[#allocation8 + $0x288] ss:$16 sps:$4 sm:$0xff]  }
 0x142   :  { %v463_v11 = vpack.c.bf16 %v455_v8, %v447_v2  ;;  %v456_v12 = vsel %vm424_vm5, %v284_v63, %v440_v5  ;;  %v363_v17 = vpop.f32.mrb[4].mxu0  ;;  %v450_v21 = vsel %vm418_vm6, %v323_v0, %v434_v9  ;;  %v3322_v62 = vld [vmem:[#allocation8 + $0x284] ss:$16 sps:$4 sm:$0xff]   ;;  %v3325_v63 = vld [vmem:[#allocation8 + $0x28c] ss:$16 sps:$4 sm:$0xff]   ;;  %v140_v4 = vsub.s32 6, %v3892_v37 }
 0x143   :  { %v464_v18 = vpack.c.bf16 %v456_v12, %v448_v6  ;;  %vm425_vm7 = vcmp.gt.f32.partialorder %v325_v10, 0.0  ;;  %v441_v20 = vmul.f32 0.01, %v325_v10  ;;  %v365_v22 = vpop.f32.mrb[5].mxu0  ;;  %vm426_vm8 = vcmp.gt.f32.partialorder %v327_v16, 0.0  ;;  %v406_v5 = vpop.f32.mrb[4].mxu1 }
 0x144   :  { %v442_v24 = vmul.f32 0.01, %v327_v16  ;;  %v364_v25 = vadd.f32 %v363_v17, %v133_v55  ;;  %v366_v26 = vadd.f32 %v365_v22, %v3916_v56  ;;  %v367_v27 = vpop.f32.mrb[6].mxu0  ;;  %v3320_v0 = vld [vmem:[#allocation8 + $0x280] ss:$16 sps:$4 sm:$0xff]   ;;  %v141_v6 = vrot.slane %v3895_v39, %v140_v4 }
 0x145   :  { %2061 = vmatprep.mubr.bf16.mxu0 %v464_v18  ;;  %2233 = vmatprep.mubr.bf16.mxu1 %v464_v18  ;;  %v457_v28 = vsel %vm425_vm7, %v325_v10, %v441_v20  ;;  %v368_v29 = vadd.f32 %v367_v27, %v133_v55  ;;  %v369_v30 = vpop.f32.mrb[7].mxu0  ;;  %v3328_v2 = vld [vmem:[#allocation8 + $0x2a4] ss:$16 sps:$4 sm:$0xff]   ;;  %v3331_v3 = vld [vmem:[#allocation8 + $0x2ac] ss:$16 sps:$4 sm:$0xff]   ;;  %v144_v9 = vsub.s32 7, %v3892_v37 }
 0x146   :  { %2062 = vmatmul.mubr.bf16.vlgmr.msra.gmra.mrb[8].mxu0 %v463_v11  ;;  %2234 = vmatmul.mubr.bf16.vlgmr.msra.gmra.mrb[8].mxu1 %v463_v11  ;;  %v3919_v32 = vpack.c.bf16 %v457_v28, %v449_v15  ;;  %v458_v33 = vsel %vm426_vm8, %v327_v16, %v442_v24  ;;  %vm419_vm9 = vcmp.gt.f32.partialorder %v364_v25, 0.0  ;;  %v435_v34 = vmul.f32 0.01, %v364_v25  ;;  %v3326_v7 = vld [vmem:[#allocation8 + $0x2a0] ss:$16 sps:$4 sm:$0xff]   ;;  %v408_v10 = vpop.f32.mrb[5].mxu1 }
 0x147   :  { %2073 = vmatpush1.bf16.msra.mxu0 %v3296_v13  ;;  %2245 = vmatpush1.bf16.msra.mxu1 %v3299_v14  ;;  %v466_v43 = vpack.c.bf16 %v458_v33, %v450_v21  ;;  %vm420_vm10 = vcmp.gt.f32.partialorder %v366_v26, 0.0  ;;  %v436_v44 = vmul.f32 0.01, %v366_v26  ;;  %vm427_vm11 = vcmp.gt.f32.partialorder %v368_v29, 0.0  ;;  %v3329_v8 = vld [vmem:[#allocation8 + $0x2a8] ss:$16 sps:$4 sm:$0xff]  }
 0x148   :  { %2074 = vmatprep.subr.bf16.mxu0 %v3304_v19  ;;  %2246 = vmatprep.subr.bf16.mxu1 %v3307_v23  ;;  %v451_v47 = vsel %vm419_vm9, %v364_v25, %v435_v34  ;;  %v443_v48 = vmul.f32 0.01, %v368_v29  ;;  %v370_v49 = vadd.f32 %v369_v30, %v3916_v56  ;;  %v3314_v56 = vld [vmem:[#allocation8 + $0x260] ss:$16 sps:$4 sm:$0xff]   ;;  %v3334_v11 = vld [vmem:[#allocation8 + $0x2c4] ss:$16 sps:$4 sm:$0xff]   ;;  %v407_v13 = vadd.f32 %v406_v5, %v141_v6 }
 0x149   :  { %2104 = vmatprep.mubr.bf16.mxu0 %v466_v43  ;;  %2276 = vmatprep.mubr.bf16.mxu1 %v466_v43  ;;  %v452_v52 = vsel %vm420_vm10, %v366_v26, %v436_v44  ;;  %v3337_v12 = vld [vmem:[#allocation8 + $0x2cc] ss:$16 sps:$4 sm:$0xff]   ;;  %v410_v14 = vpop.f32.mrb[6].mxu1  ;;  %v145_v15 = vrot.slane %v3895_v39, %v144_v9  ;;  %v3332_v18 = vld [vmem:[#allocation8 + $0x2c0] ss:$16 sps:$4 sm:$0xff]  }
 0x14a   :  { %v459_v50 = vsel %vm427_vm11, %v368_v29, %v443_v48  ;;  %vm428_vm12 = vcmp.gt.f32.partialorder %v370_v49, 0.0  ;;  %v444_v51 = vmul.f32 0.01, %v370_v49  ;;  %v411_v16 = vadd.f32 %v410_v14, %v141_v6  ;;  %v412_v17 = vpop.f32.mrb[7].mxu1  ;;  %v3335_v20 = vld [vmem:[#allocation8 + $0x2c8] ss:$16 sps:$4 sm:$0xff]  }
 0x14b   :  { %2075 = vmatpush1.bf16.msra.mxu0 %v3302_v31  ;;  %2247 = vmatpush1.bf16.msra.mxu1 %v3305_v35  ;;  %v3922_v55 = vpack.c.bf16 %v459_v50, %v451_v47  ;;  %vm421_vm13 = vcmp.gt.f32.partialorder %v407_v13, 0.0  ;;  %v437_v19 = vmul.f32 0.01, %v407_v13  ;;  %v409_v21 = vadd.f32 %v408_v10, %v145_v15  ;;  %v3340_v24 = vld [vmem:[#allocation8 + $0x2e4] ss:$16 sps:$4 sm:$0xff]  }
 0x14c   :  { %2076 = vmatprep.subr.bf16.mxu0 %v3310_v45  ;;  %2248 = vmatprep.subr.bf16.mxu1 %v3313_v46  ;;  %v460_v59 = vsel %vm428_vm12, %v370_v49, %v444_v51  ;;  %vm429_vm14 = vcmp.gt.f32.partialorder %v411_v16, 0.0  ;;  %v445_v22 = vmul.f32 0.01, %v411_v16  ;;  %v413_v23 = vadd.f32 %v412_v17, %v145_v15  ;;  %v3343_v25 = vld [vmem:[#allocation8 + $0x2ec] ss:$16 sps:$4 sm:$0xff]  }
 0x14d   :  { %v3924_v60 = vpack.c.bf16 %v460_v59, %v452_v52  ;;  %v453_v26 = vsel %vm421_vm13, %v407_v13, %v437_v19  ;;  %vm422_vm15 = vcmp.gt.f32.partialorder %v409_v21, 0.0  ;;  %v438_v27 = vmul.f32 0.01, %v409_v21  ;;  %v3338_v30 = vld [vmem:[#allocation8 + $0x2e0] ss:$16 sps:$4 sm:$0xff]  }
 0x14e   :  { %v461_v39 = vsel %vm429_vm14, %v411_v16, %v445_v22  ;;  %vm430_vm0 = vcmp.gt.f32.partialorder %v413_v23, 0.0  ;;  %v446_v29 = vmul.f32 0.01, %v413_v23  ;;  %v3341_v31 = vld [vmem:[#allocation8 + $0x2e8] ss:$16 sps:$4 sm:$0xff]  }
 0x14f   :  { %2077 = vmatpush1.bf16.msra.mxu0 %v3308_v53  ;;  %2249 = vmatpush1.bf16.msra.mxu1 %v3311_v54  ;;  %v3930_v28 = vpack.c.bf16 %v461_v39, %v453_v26  ;;  %v454_v33 = vsel %vm422_vm15, %v409_v21, %v438_v27  ;;  %v3346_v34 = vld [vmem:[#allocation8 + $0x304] ss:$16 sps:$4 sm:$0xff]   ;;  %v3349_v35 = vld [vmem:[#allocation8 + $0x30c] ss:$16 sps:$4 sm:$0xff]   ;;  %v3344_v45 = vld [vmem:[#allocation8 + $0x300] ss:$16 sps:$4 sm:$0xff]  }
 0x150   :  { %2078 = vmatprep.subr.bf16.mxu0 %v3316_v57  ;;  %2250 = vmatprep.subr.bf16.mxu1 %v3319_v58  ;;  %v462_v43 = vsel %vm430_vm0, %v413_v23, %v446_v29  ;;  %v3347_v46 = vld [vmem:[#allocation8 + $0x308] ss:$16 sps:$4 sm:$0xff]   ;;  %v3352_v47 = vld [vmem:[#allocation8 + $0x324] ss:$16 sps:$4 sm:$0xff]   ;;  %v3355_v48 = vld [vmem:[#allocation8 + $0x32c] ss:$16 sps:$4 sm:$0xff]  }
 0x151   :  { %v3932_v44 = vpack.c.bf16 %v462_v43, %v454_v33  ;;  %v3350_v49 = vld [vmem:[#allocation8 + $0x320] ss:$16 sps:$4 sm:$0xff]   ;;  %v3353_v50 = vld [vmem:[#allocation8 + $0x328] ss:$16 sps:$4 sm:$0xff]   ;;  %v3358_v51 = vld [vmem:[#allocation8 + $0x344] ss:$16 sps:$4 sm:$0xff]  }
 0x152   :  { %v3361_v52 = vld [vmem:[#allocation8 + $0x34c] ss:$16 sps:$4 sm:$0xff]   ;;  %v3356_v53 = vld [vmem:[#allocation8 + $0x340] ss:$16 sps:$4 sm:$0xff]   ;;  %v3359_v54 = vld [vmem:[#allocation8 + $0x348] ss:$16 sps:$4 sm:$0xff]  }
 0x153   :  { %2079 = vmatpush1.bf16.msra.mxu0 %v3314_v56  ;;  %2251 = vmatpush1.bf16.msra.mxu1 %v3317_v61  ;;  %v3364_v57 = vld [vmem:[#allocation8 + $0x364] ss:$16 sps:$4 sm:$0xff]   ;;  %v3367_v58 = vld [vmem:[#allocation8 + $0x36c] ss:$16 sps:$4 sm:$0xff]   ;;  %v3362_v59 = vld [vmem:[#allocation8 + $0x360] ss:$16 sps:$4 sm:$0xff]  }
 0x154   :  { %2080 = vmatprep.subr.bf16.mxu0 %v3322_v62  ;;  %2252 = vmatprep.subr.bf16.mxu1 %v3325_v63  ;;  %v3365_v56 = vld [vmem:[#allocation8 + $0x368] ss:$16 sps:$4 sm:$0xff]   ;;  %v3370_v61 = vld [vmem:[#allocation8 + $0x384] ss:$16 sps:$4 sm:$0xff]   ;;  %v3373_v62 = vld [vmem:[#allocation8 + $0x38c] ss:$16 sps:$4 sm:$0xff]  }
 0x155   :  { %v3368_v63 = vld [vmem:[#allocation8 + $0x380] ss:$16 sps:$4 sm:$0xff]   ;;  %v3377_v4 = vld [vmem:[#allocation8 + $0x3a8] ss:$16 sps:$4 sm:$0xff]   ;;  %v3382_v5 = vld [vmem:[#allocation8 + $0x3c4] ss:$16 sps:$4 sm:$0xff]  }
 0x156   :  { %v3385_v6 = vld [vmem:[#allocation8 + $0x3cc] ss:$16 sps:$4 sm:$0xff]   ;;  %v3388_v9 = vld [vmem:[#allocation8 + $0x3e4] ss:$16 sps:$4 sm:$0xff]   ;;  %v3392_v15 = vld [vmem:[#allocation8 + $0x400] ss:$16 sps:$4 sm:$0xff]  }
 0x157   :  { %2081 = vmatpush1.bf16.msra.mxu0 %v3320_v0  ;;  %2253 = vmatpush1.bf16.msra.mxu1 %v3323_v1  ;;  %v3371_v0 = vld [vmem:[#allocation8 + $0x388] ss:$16 sps:$4 sm:$0xff]   ;;  %v3376_v1 = vld [vmem:[#allocation8 + $0x3a4] ss:$16 sps:$4 sm:$0xff]   ;;  %v3391_v10 = vld [vmem:[#allocation8 + $0x3ec] ss:$16 sps:$4 sm:$0xff]  }
 0x158   :  { %2082 = vmatprep.subr.bf16.mxu0 %v3328_v2  ;;  %2254 = vmatprep.subr.bf16.mxu1 %v3331_v3  ;;  %v3379_v2 = vld [vmem:[#allocation8 + $0x3ac] ss:$16 sps:$4 sm:$0xff]   ;;  %v3374_v3 = vld [vmem:[#allocation8 + $0x3a0] ss:$16 sps:$4 sm:$0xff]   ;;  %v3394_v13 = vld [vmem:[#allocation8 + $0x404] ss:$16 sps:$4 sm:$0xff]  }
 0x159   :  { %v3397_v14 = vld [vmem:[#allocation8 + $0x40c] ss:$16 sps:$4 sm:$0xff]   ;;  %v3395_v16 = vld [vmem:[#allocation8 + $0x408] ss:$16 sps:$4 sm:$0xff]   ;;  %v3400_v17 = vld [vmem:[#allocation8 + $0x424] ss:$16 sps:$4 sm:$0xff]  }
 0x15a   :  { %v3398_v19 = vld [vmem:[#allocation8 + $0x420] ss:$16 sps:$4 sm:$0xff]   ;;  %v3406_v21 = vld [vmem:[#allocation8 + $0x444] ss:$16 sps:$4 sm:$0xff]   ;;  %v3409_v22 = vld [vmem:[#allocation8 + $0x44c] ss:$16 sps:$4 sm:$0xff]  }
 0x15b   :  { %2083 = vmatpush1.bf16.msra.mxu0 %v3326_v7  ;;  %2255 = vmatpush1.bf16.msra.mxu1 %v3329_v8  ;;  %v3380_v7 = vld [vmem:[#allocation8 + $0x3c0] ss:$16 sps:$4 sm:$0xff]   ;;  %v3383_v8 = vld [vmem:[#allocation8 + $0x3c8] ss:$16 sps:$4 sm:$0xff]   ;;  %v3418_v39 = vld [vmem:[#allocation8 + $0x484] ss:$16 sps:$4 sm:$0xff]  }
 0x15c   :  { %2084 = vmatprep.subr.bf16.mxu0 %v3334_v11  ;;  %2256 = vmatprep.subr.bf16.mxu1 %v3337_v12  ;;  %v3386_v11 = vld [vmem:[#allocation8 + $0x3e0] ss:$16 sps:$4 sm:$0xff]   ;;  %v3389_v12 = vld [vmem:[#allocation8 + $0x3e8] ss:$16 sps:$4 sm:$0xff]   ;;  %v3421_v29 = vld [vmem:[#allocation8 + $0x48c] ss:$16 sps:$4 sm:$0xff]  }
 0x15d   :  { %v3404_v23 = vld [vmem:[#allocation8 + $0x440] ss:$16 sps:$4 sm:$0xff]   ;;  %v3413_v27 = vld [vmem:[#allocation8 + $0x468] ss:$16 sps:$4 sm:$0xff]   ;;  %v3427_v33 = vld [vmem:[#allocation8 + $0x4ac] ss:$16 sps:$4 sm:$0xff]  }
 0x15e   :  { %v3410_v26 = vld [vmem:[#allocation8 + $0x460] ss:$16 sps:$4 sm:$0xff]   ;;  %v3430_v43 = vld [vmem:[#allocation8 + $0x4c4] ss:$16 sps:$4 sm:$0xff]  }
 0x15f   :  { %2085 = vmatpush1.bf16.msra.mxu0 %v3332_v18  ;;  %2257 = vmatpush1.bf16.msra.mxu1 %v3335_v20  ;;  %v3403_v18 = vld [vmem:[#allocation8 + $0x42c] ss:$16 sps:$4 sm:$0xff]   ;;  %v3401_v20 = vld [vmem:[#allocation8 + $0x428] ss:$16 sps:$4 sm:$0xff]  }
 0x160   :  { %2086 = vmatprep.subr.bf16.mxu0 %v3340_v24  ;;  %2258 = vmatprep.subr.bf16.mxu1 %v3343_v25  ;;  %v3407_v24 = vld [vmem:[#allocation8 + $0x448] ss:$16 sps:$4 sm:$0xff]   ;;  %v3412_v25 = vld [vmem:[#allocation8 + $0x464] ss:$16 sps:$4 sm:$0xff]  }
 0x163   :  { %2087 = vmatpush1.bf16.msra.mxu0 %v3338_v30  ;;  %2259 = vmatpush1.bf16.msra.mxu1 %v3341_v31  ;;  %v3416_v30 = vld [vmem:[#allocation8 + $0x480] ss:$16 sps:$4 sm:$0xff]   ;;  %v3424_v31 = vld [vmem:[#allocation8 + $0x4a4] ss:$16 sps:$4 sm:$0xff]  }
 0x164   :  { %2088 = vmatprep.subr.bf16.mxu0 %v3346_v34  ;;  %2260 = vmatprep.subr.bf16.mxu1 %v3349_v35  ;;  %v3422_v34 = vld [vmem:[#allocation8 + $0x4a0] ss:$16 sps:$4 sm:$0xff]   ;;  %v3425_v35 = vld [vmem:[#allocation8 + $0x4a8] ss:$16 sps:$4 sm:$0xff]  }
 0x167   :  { %2089 = vmatpush1.bf16.msra.mxu0 %v3344_v45  ;;  %2261 = vmatpush1.bf16.msra.mxu1 %v3347_v46  ;;  %v3433_v45 = vld [vmem:[#allocation8 + $0x4cc] ss:$16 sps:$4 sm:$0xff]   ;;  %v3428_v46 = vld [vmem:[#allocation8 + $0x4c0] ss:$16 sps:$4 sm:$0xff]  }
 0x168   :  { %2090 = vmatprep.subr.bf16.mxu0 %v3352_v47  ;;  %2262 = vmatprep.subr.bf16.mxu1 %v3355_v48  ;;  %v3431_v47 = vld [vmem:[#allocation8 + $0x4c8] ss:$16 sps:$4 sm:$0xff]   ;;  %v3436_v48 = vld [vmem:[#allocation8 + $0x4e4] ss:$16 sps:$4 sm:$0xff]  }
 0x16b   :  { %2091 = vmatpush1.bf16.msra.mxu0 %v3350_v49  ;;  %2263 = vmatpush1.bf16.msra.mxu1 %v3353_v50  ;;  %v3439_v49 = vld [vmem:[#allocation8 + $0x4ec] ss:$16 sps:$4 sm:$0xff]   ;;  %v3434_v50 = vld [vmem:[#allocation8 + $0x4e0] ss:$16 sps:$4 sm:$0xff]  }
 0x16c   :  { %2092 = vmatprep.subr.bf16.mxu0 %v3358_v51  ;;  %2264 = vmatprep.subr.bf16.mxu1 %v3361_v52  ;;  %v3437_v51 = vld [vmem:[#allocation8 + $0x4e8] ss:$16 sps:$4 sm:$0xff]   ;;  %v3442_v52 = vld [vmem:[#allocation8 + $0x504] ss:$16 sps:$4 sm:$0xff]  }
 0x16f   :  { %2093 = vmatpush1.bf16.msra.mxu0 %v3356_v53  ;;  %2265 = vmatpush1.bf16.msra.mxu1 %v3359_v54  ;;  %v3445_v53 = vld [vmem:[#allocation8 + $0x50c] ss:$16 sps:$4 sm:$0xff]   ;;  %v3440_v54 = vld [vmem:[#allocation8 + $0x500] ss:$16 sps:$4 sm:$0xff]  }
 0x170   :  { %2094 = vmatprep.subr.bf16.mxu0 %v3364_v57  ;;  %2266 = vmatprep.subr.bf16.mxu1 %v3367_v58  ;;  %v3443_v57 = vld [vmem:[#allocation8 + $0x508] ss:$16 sps:$4 sm:$0xff]   ;;  %v3448_v58 = vld [vmem:[#allocation8 + $0x524] ss:$16 sps:$4 sm:$0xff]  }
 0x173   :  { %2095 = vmatpush1.bf16.msra.mxu0 %v3362_v59  ;;  %2267 = vmatpush1.bf16.msra.mxu1 %v3365_v56  ;;  %v3451_v59 = vld [vmem:[#allocation8 + $0x52c] ss:$16 sps:$4 sm:$0xff]   ;;  %v3446_v56 = vld [vmem:[#allocation8 + $0x520] ss:$16 sps:$4 sm:$0xff]  }
 0x174   :  { %2096 = vmatprep.subr.bf16.mxu0 %v3370_v61  ;;  %2268 = vmatprep.subr.bf16.mxu1 %v3373_v62  ;;  %v3449_v61 = vld [vmem:[#allocation8 + $0x528] ss:$16 sps:$4 sm:$0xff]   ;;  %v3454_v62 = vld [vmem:[#allocation8 + $0x544] ss:$16 sps:$4 sm:$0xff]  }
 0x177   :  { %2097 = vmatpush1.bf16.msra.mxu0 %v3368_v63  ;;  %2269 = vmatpush1.bf16.msra.mxu1 %v3371_v0  ;;  %v3457_v63 = vld [vmem:[#allocation8 + $0x54c] ss:$16 sps:$4 sm:$0xff]   ;;  %v3452_v0 = vld [vmem:[#allocation8 + $0x540] ss:$16 sps:$4 sm:$0xff]  }
 0x178   :  { %2098 = vmatprep.subr.bf16.mxu0 %v3376_v1  ;;  %2270 = vmatprep.subr.bf16.mxu1 %v3379_v2  ;;  %v3455_v1 = vld [vmem:[#allocation8 + $0x548] ss:$16 sps:$4 sm:$0xff]   ;;  %v3460_v2 = vld [vmem:[#allocation8 + $0x564] ss:$16 sps:$4 sm:$0xff]  }
 0x17b   :  { %2099 = vmatpush1.bf16.msra.mxu0 %v3374_v3  ;;  %2271 = vmatpush1.bf16.msra.mxu1 %v3377_v4  ;;  %v3463_v3 = vld [vmem:[#allocation8 + $0x56c] ss:$16 sps:$4 sm:$0xff]   ;;  %v3458_v4 = vld [vmem:[#allocation8 + $0x560] ss:$16 sps:$4 sm:$0xff]  }
 0x17c   :  { %2100 = vmatprep.subr.bf16.mxu0 %v3382_v5  ;;  %2272 = vmatprep.subr.bf16.mxu1 %v3385_v6  ;;  %v3461_v5 = vld [vmem:[#allocation8 + $0x568] ss:$16 sps:$4 sm:$0xff]   ;;  %v3466_v6 = vld [vmem:[#allocation8 + $0x584] ss:$16 sps:$4 sm:$0xff]  }
 0x17f   :  { %2101 = vmatpush1.bf16.msra.mxu0 %v3380_v7  ;;  %2273 = vmatpush1.bf16.msra.mxu1 %v3383_v8  ;;  %v3469_v7 = vld [vmem:[#allocation8 + $0x58c] ss:$16 sps:$4 sm:$0xff]   ;;  %v3464_v8 = vld [vmem:[#allocation8 + $0x580] ss:$16 sps:$4 sm:$0xff]  }
 0x180   :  { %2102 = vmatprep.subr.bf16.mxu0 %v3388_v9  ;;  %2274 = vmatprep.subr.bf16.mxu1 %v3391_v10  ;;  %v3467_v9 = vld [vmem:[#allocation8 + $0x588] ss:$16 sps:$4 sm:$0xff]   ;;  %v3472_v10 = vld [vmem:[#allocation8 + $0x5a4] ss:$16 sps:$4 sm:$0xff]  }
 0x183   :  { %2103 = vmatpush1.bf16.msra.mxu0 %v3386_v11  ;;  %2275 = vmatpush1.bf16.msra.mxu1 %v3389_v12  ;;  %v3475_v11 = vld [vmem:[#allocation8 + $0x5ac] ss:$16 sps:$4 sm:$0xff]   ;;  %v3470_v12 = vld [vmem:[#allocation8 + $0x5a0] ss:$16 sps:$4 sm:$0xff]  }
 0x184   :  { %2115 = vmatprep.subr.bf16.mxu0 %v3394_v13  ;;  %2287 = vmatprep.subr.bf16.mxu1 %v3397_v14  ;;  %v3473_v13 = vld [vmem:[#allocation8 + $0x5a8] ss:$16 sps:$4 sm:$0xff]   ;;  %v3478_v14 = vld [vmem:[#allocation8 + $0x5c4] ss:$16 sps:$4 sm:$0xff]  }
 0x186   :  { %2105 = vmatmul.mubr.bf16.vlgmr.msra.gmra.mrb[8].mxu0 %v3919_v32  ;;  %2277 = vmatmul.mubr.bf16.vlgmr.msra.gmra.mrb[8].mxu1 %v3919_v32  ;;  %v3415_v32 = vld [vmem:[#allocation8 + $0x46c] ss:$16 sps:$4 sm:$0xff]  }
 0x187   :  { %2116 = vmatpush1.bf16.msra.mxu0 %v3392_v15  ;;  %2288 = vmatpush1.bf16.msra.mxu1 %v3395_v16  ;;  %v3481_v15 = vld [vmem:[#allocation8 + $0x5cc] ss:$16 sps:$4 sm:$0xff]   ;;  %v3476_v16 = vld [vmem:[#allocation8 + $0x5c0] ss:$16 sps:$4 sm:$0xff]  }
 0x188   :  { %2117 = vmatprep.subr.bf16.mxu0 %v3400_v17  ;;  %2289 = vmatprep.subr.bf16.mxu1 %v3403_v18  ;;  %v3479_v17 = vld [vmem:[#allocation8 + $0x5c8] ss:$16 sps:$4 sm:$0xff]   ;;  %v3484_v18 = vld [vmem:[#allocation8 + $0x5e4] ss:$16 sps:$4 sm:$0xff]  }
 0x189   :  { %2147 = vmatprep.mubr.bf16.mxu0 %v3924_v60  ;;  %2319 = vmatprep.mubr.bf16.mxu1 %v3924_v60  ;;  %v3419_v60 = vld [vmem:[#allocation8 + $0x488] ss:$16 sps:$4 sm:$0xff]  }
 0x18b   :  { %2118 = vmatpush1.bf16.msra.mxu0 %v3398_v19  ;;  %2290 = vmatpush1.bf16.msra.mxu1 %v3401_v20  ;;  %v3487_v19 = vld [vmem:[#allocation8 + $0x5ec] ss:$16 sps:$4 sm:$0xff]   ;;  %v3482_v20 = vld [vmem:[#allocation8 + $0x5e0] ss:$16 sps:$4 sm:$0xff]  }
 0x18c   :  { %2119 = vmatprep.subr.bf16.mxu0 %v3406_v21  ;;  %2291 = vmatprep.subr.bf16.mxu1 %v3409_v22  ;;  %v3485_v21 = vld [vmem:[#allocation8 + $0x5e8] ss:$16 sps:$4 sm:$0xff]   ;;  %v3490_v22 = vld [vmem:[#allocation8 + $0x604] ss:$16 sps:$4 sm:$0xff]  }
 0x18f   :  { %2120 = vmatpush1.bf16.msra.mxu0 %v3404_v23  ;;  %2292 = vmatpush1.bf16.msra.mxu1 %v3407_v24  ;;  %v3493_v23 = vld [vmem:[#allocation8 + $0x60c] ss:$16 sps:$4 sm:$0xff]   ;;  %v3488_v24 = vld [vmem:[#allocation8 + $0x600] ss:$16 sps:$4 sm:$0xff]  }
 0x190   :  { %2121 = vmatprep.subr.bf16.mxu0 %v3412_v25  ;;  %2293 = vmatprep.subr.bf16.mxu1 %v3415_v32  ;;  %v3491_v25 = vld [vmem:[#allocation8 + $0x608] ss:$16 sps:$4 sm:$0xff]   ;;  %v3496_v32 = vld [vmem:[#allocation8 + $0x624] ss:$16 sps:$4 sm:$0xff]  }
 0x193   :  { %2122 = vmatpush1.bf16.msra.mxu0 %v3410_v26  ;;  %2294 = vmatpush1.bf16.msra.mxu1 %v3413_v27  ;;  %v3499_v26 = vld [vmem:[#allocation8 + $0x62c] ss:$16 sps:$4 sm:$0xff]   ;;  %v3494_v27 = vld [vmem:[#allocation8 + $0x620] ss:$16 sps:$4 sm:$0xff]  }
 0x194   :  { %2123 = vmatprep.subr.bf16.mxu0 %v3418_v39  ;;  %2295 = vmatprep.subr.bf16.mxu1 %v3421_v29  ;;  %v3497_v39 = vld [vmem:[#allocation8 + $0x628] ss:$16 sps:$4 sm:$0xff]   ;;  %v3502_v29 = vld [vmem:[#allocation8 + $0x644] ss:$16 sps:$4 sm:$0xff]  }
 0x197   :  { %2124 = vmatpush1.bf16.msra.mxu0 %v3416_v30  ;;  %2296 = vmatpush1.bf16.msra.mxu1 %v3419_v60  ;;  %v3505_v30 = vld [vmem:[#allocation8 + $0x64c] ss:$16 sps:$4 sm:$0xff]   ;;  %v3500_v60 = vld [vmem:[#allocation8 + $0x640] ss:$16 sps:$4 sm:$0xff]  }
 0x198   :  { %2125 = vmatprep.subr.bf16.mxu0 %v3424_v31  ;;  %2297 = vmatprep.subr.bf16.mxu1 %v3427_v33  ;;  %v3503_v31 = vld [vmem:[#allocation8 + $0x648] ss:$16 sps:$4 sm:$0xff]   ;;  %v3508_v33 = vld [vmem:[#allocation8 + $0x664] ss:$16 sps:$4 sm:$0xff]  }
 0x19b   :  { %2126 = vmatpush1.bf16.msra.mxu0 %v3422_v34  ;;  %2298 = vmatpush1.bf16.msra.mxu1 %v3425_v35  ;;  %v3506_v34 = vld [vmem:[#allocation8 + $0x660] ss:$16 sps:$4 sm:$0xff]   ;;  %v3509_v35 = vld [vmem:[#allocation8 + $0x668] ss:$16 sps:$4 sm:$0xff]  }
 0x19c   :  { %2127 = vmatprep.subr.bf16.mxu0 %v3430_v43  ;;  %2299 = vmatprep.subr.bf16.mxu1 %v3433_v45  ;;  %v3514_v43 = vld [vmem:[#allocation8 + $0x684] ss:$16 sps:$4 sm:$0xff]   ;;  %v3517_v45 = vld [vmem:[#allocation8 + $0x68c] ss:$16 sps:$4 sm:$0xff]  }
 0x19f   :  { %2128 = vmatpush1.bf16.msra.mxu0 %v3428_v46  ;;  %2300 = vmatpush1.bf16.msra.mxu1 %v3431_v47  ;;  %v3512_v46 = vld [vmem:[#allocation8 + $0x680] ss:$16 sps:$4 sm:$0xff]   ;;  %v3520_v47 = vld [vmem:[#allocation8 + $0x6a4] ss:$16 sps:$4 sm:$0xff]  }
 0x1a0   :  { %2129 = vmatprep.subr.bf16.mxu0 %v3436_v48  ;;  %2301 = vmatprep.subr.bf16.mxu1 %v3439_v49  ;;  %v3523_v48 = vld [vmem:[#allocation8 + $0x6ac] ss:$16 sps:$4 sm:$0xff]   ;;  %v3518_v49 = vld [vmem:[#allocation8 + $0x6a0] ss:$16 sps:$4 sm:$0xff]  }
 0x1a3   :  { %2130 = vmatpush1.bf16.msra.mxu0 %v3434_v50  ;;  %2302 = vmatpush1.bf16.msra.mxu1 %v3437_v51  ;;  %v3521_v50 = vld [vmem:[#allocation8 + $0x6a8] ss:$16 sps:$4 sm:$0xff]   ;;  %v3526_v51 = vld [vmem:[#allocation8 + $0x6c4] ss:$16 sps:$4 sm:$0xff]  }
 0x1a4   :  { %2131 = vmatprep.subr.bf16.mxu0 %v3442_v52  ;;  %2303 = vmatprep.subr.bf16.mxu1 %v3445_v53  ;;  %v3529_v52 = vld [vmem:[#allocation8 + $0x6cc] ss:$16 sps:$4 sm:$0xff]   ;;  %v3524_v53 = vld [vmem:[#allocation8 + $0x6c0] ss:$16 sps:$4 sm:$0xff]  }
 0x1a7   :  { %2132 = vmatpush1.bf16.msra.mxu0 %v3440_v54  ;;  %2304 = vmatpush1.bf16.msra.mxu1 %v3443_v57  ;;  %v3527_v54 = vld [vmem:[#allocation8 + $0x6c8] ss:$16 sps:$4 sm:$0xff]   ;;  %v3532_v57 = vld [vmem:[#allocation8 + $0x6e4] ss:$16 sps:$4 sm:$0xff]  }
 0x1a8   :  { %2133 = vmatprep.subr.bf16.mxu0 %v3448_v58  ;;  %2305 = vmatprep.subr.bf16.mxu1 %v3451_v59  ;;  %v3535_v58 = vld [vmem:[#allocation8 + $0x6ec] ss:$16 sps:$4 sm:$0xff]   ;;  %v3530_v59 = vld [vmem:[#allocation8 + $0x6e0] ss:$16 sps:$4 sm:$0xff]  }
 0x1ab   :  { %2134 = vmatpush1.bf16.msra.mxu0 %v3446_v56  ;;  %2306 = vmatpush1.bf16.msra.mxu1 %v3449_v61  ;;  %v3533_v56 = vld [vmem:[#allocation8 + $0x6e8] ss:$16 sps:$4 sm:$0xff]   ;;  %v3538_v61 = vld [vmem:[#allocation8 + $0x704] ss:$16 sps:$4 sm:$0xff]  }
 0x1ac   :  { %2135 = vmatprep.subr.bf16.mxu0 %v3454_v62  ;;  %2307 = vmatprep.subr.bf16.mxu1 %v3457_v63  ;;  %v3541_v62 = vld [vmem:[#allocation8 + $0x70c] ss:$16 sps:$4 sm:$0xff]   ;;  %v3536_v63 = vld [vmem:[#allocation8 + $0x700] ss:$16 sps:$4 sm:$0xff]  }
 0x1af   :  { %2136 = vmatpush1.bf16.msra.mxu0 %v3452_v0  ;;  %2308 = vmatpush1.bf16.msra.mxu1 %v3455_v1  ;;  %v3539_v0 = vld [vmem:[#allocation8 + $0x708] ss:$16 sps:$4 sm:$0xff]   ;;  %v3544_v1 = vld [vmem:[#allocation8 + $0x724] ss:$16 sps:$4 sm:$0xff]  }
 0x1b0   :  { %2137 = vmatprep.subr.bf16.mxu0 %v3460_v2  ;;  %2309 = vmatprep.subr.bf16.mxu1 %v3463_v3  ;;  %v3547_v2 = vld [vmem:[#allocation8 + $0x72c] ss:$16 sps:$4 sm:$0xff]   ;;  %v3542_v3 = vld [vmem:[#allocation8 + $0x720] ss:$16 sps:$4 sm:$0xff]  }
 0x1b3   :  { %2138 = vmatpush1.bf16.msra.mxu0 %v3458_v4  ;;  %2310 = vmatpush1.bf16.msra.mxu1 %v3461_v5  ;;  %v3545_v4 = vld [vmem:[#allocation8 + $0x728] ss:$16 sps:$4 sm:$0xff]   ;;  %v3550_v5 = vld [vmem:[#allocation8 + $0x744] ss:$16 sps:$4 sm:$0xff]  }
 0x1b4   :  { %2139 = vmatprep.subr.bf16.mxu0 %v3466_v6  ;;  %2311 = vmatprep.subr.bf16.mxu1 %v3469_v7  ;;  %v3553_v6 = vld [vmem:[#allocation8 + $0x74c] ss:$16 sps:$4 sm:$0xff]   ;;  %v3548_v7 = vld [vmem:[#allocation8 + $0x740] ss:$16 sps:$4 sm:$0xff]  }
 0x1b7   :  { %2140 = vmatpush1.bf16.msra.mxu0 %v3464_v8  ;;  %2312 = vmatpush1.bf16.msra.mxu1 %v3467_v9  ;;  %v3551_v8 = vld [vmem:[#allocation8 + $0x748] ss:$16 sps:$4 sm:$0xff]   ;;  %v3556_v9 = vld [vmem:[#allocation8 + $0x764] ss:$16 sps:$4 sm:$0xff]  }
 0x1b8   :  { %2141 = vmatprep.subr.bf16.mxu0 %v3472_v10  ;;  %2313 = vmatprep.subr.bf16.mxu1 %v3475_v11  ;;  %v3559_v10 = vld [vmem:[#allocation8 + $0x76c] ss:$16 sps:$4 sm:$0xff]   ;;  %v3554_v11 = vld [vmem:[#allocation8 + $0x760] ss:$16 sps:$4 sm:$0xff]  }
 0x1bb   :  { %2142 = vmatpush1.bf16.msra.mxu0 %v3470_v12  ;;  %2314 = vmatpush1.bf16.msra.mxu1 %v3473_v13  ;;  %v3557_v12 = vld [vmem:[#allocation8 + $0x768] ss:$16 sps:$4 sm:$0xff]   ;;  %v3562_v13 = vld [vmem:[#allocation8 + $0x784] ss:$16 sps:$4 sm:$0xff]  }
 0x1bc   :  { %2143 = vmatprep.subr.bf16.mxu0 %v3478_v14  ;;  %2315 = vmatprep.subr.bf16.mxu1 %v3481_v15  ;;  %v3565_v14 = vld [vmem:[#allocation8 + $0x78c] ss:$16 sps:$4 sm:$0xff]   ;;  %v3560_v15 = vld [vmem:[#allocation8 + $0x780] ss:$16 sps:$4 sm:$0xff]  }
 0x1bf   :  { %2144 = vmatpush1.bf16.msra.mxu0 %v3476_v16  ;;  %2316 = vmatpush1.bf16.msra.mxu1 %v3479_v17  ;;  %v3563_v16 = vld [vmem:[#allocation8 + $0x788] ss:$16 sps:$4 sm:$0xff]   ;;  %v3568_v17 = vld [vmem:[#allocation8 + $0x7a4] ss:$16 sps:$4 sm:$0xff]  }
 0x1c0   :  { %2145 = vmatprep.subr.bf16.mxu0 %v3484_v18  ;;  %2317 = vmatprep.subr.bf16.mxu1 %v3487_v19  ;;  %v3571_v18 = vld [vmem:[#allocation8 + $0x7ac] ss:$16 sps:$4 sm:$0xff]   ;;  %v3566_v19 = vld [vmem:[#allocation8 + $0x7a0] ss:$16 sps:$4 sm:$0xff]  }
 0x1c3   :  { %2146 = vmatpush1.bf16.msra.mxu0 %v3482_v20  ;;  %2318 = vmatpush1.bf16.msra.mxu1 %v3485_v21  ;;  %v3569_v20 = vld [vmem:[#allocation8 + $0x7a8] ss:$16 sps:$4 sm:$0xff]   ;;  %v3574_v21 = vld [vmem:[#allocation8 + $0x7c4] ss:$16 sps:$4 sm:$0xff]  }
 0x1c4   :  { %2158 = vmatprep.subr.bf16.mxu0 %v3490_v22  ;;  %2330 = vmatprep.subr.bf16.mxu1 %v3493_v23  ;;  %v3577_v22 = vld [vmem:[#allocation8 + $0x7cc] ss:$16 sps:$4 sm:$0xff]   ;;  %v3572_v23 = vld [vmem:[#allocation8 + $0x7c0] ss:$16 sps:$4 sm:$0xff]  }
 0x1c6   :  { %2148 = vmatmul.mubr.bf16.vlgmr.msra.gmra.mrb[8].mxu0 %v3922_v55  ;;  %2320 = vmatmul.mubr.bf16.vlgmr.msra.gmra.mrb[8].mxu1 %v3922_v55  ;;  %v3511_v55 = vld [vmem:[#allocation8 + $0x66c] ss:$16 sps:$4 sm:$0xff]  }
 0x1c7   :  { %2159 = vmatpush1.bf16.msra.mxu0 %v3488_v24  ;;  %2331 = vmatpush1.bf16.msra.mxu1 %v3491_v25  ;;  %v3575_v24 = vld [vmem:[#allocation8 + $0x7c8] ss:$16 sps:$4 sm:$0xff]   ;;  %v3580_v25 = vld [vmem:[#allocation8 + $0x7e4] ss:$16 sps:$4 sm:$0xff]  }
 0x1c8   :  { %2160 = vmatprep.subr.bf16.mxu0 %v3496_v32  ;;  %2332 = vmatprep.subr.bf16.mxu1 %v3499_v26  ;;  %v3583_v32 = vld [vmem:[#allocation8 + $0x7ec] ss:$16 sps:$4 sm:$0xff]   ;;  %v3578_v26 = vld [vmem:[#allocation8 + $0x7e0] ss:$16 sps:$4 sm:$0xff]  }
 0x1c9   :  { %2190 = vmatprep.mubr.bf16.mxu0 %v3932_v44  ;;  %2362 = vmatprep.mubr.bf16.mxu1 %v3932_v44  ;;  %v3515_v44 = vld [vmem:[#allocation8 + $0x688] ss:$16 sps:$4 sm:$0xff]  }
 0x1cb   :  { %2161 = vmatpush1.bf16.msra.mxu0 %v3494_v27  ;;  %2333 = vmatpush1.bf16.msra.mxu1 %v3497_v39  ;;  %v3581_v27 = vld [vmem:[#allocation8 + $0x7e8] ss:$16 sps:$4 sm:$0xff]   ;;  %v3584_v39 = vld [vmem:[#allocation10 + $0x40] sm:$0xff]  }
 0x1cc   :  { %2162 = vmatprep.subr.bf16.mxu0 %v3502_v29  ;;  %2334 = vmatprep.subr.bf16.mxu1 %v3505_v30  ;;  %v3585_v29 = vld [vmem:[#allocation10 + $0xc0] sm:$0xff]  }
 0x1cd   :  { %v3586_v30 = vld [vmem:[#allocation10] sm:$0xff]  }
 0x1cf   :  { %2163 = vmatpush1.bf16.msra.mxu0 %v3500_v60  ;;  %2335 = vmatpush1.bf16.msra.mxu1 %v3503_v31  ;;  %v3587_v60 = vld [vmem:[#allocation10 + $0x80] sm:$0xff]   ;;  %v3588_v31 = vld [vmem:[#allocation10 + $0x48] sm:$0xff]  }
 0x1d0   :  { %2164 = vmatprep.subr.bf16.mxu0 %v3508_v33  ;;  %2336 = vmatprep.subr.bf16.mxu1 %v3511_v55  ;;  %v3589_v33 = vld [vmem:[#allocation10 + $0xc8] sm:$0xff]  }
 0x1d1   :  { %v3590_v55 = vld [vmem:[#allocation10 + $0x8] sm:$0xff]  }
 0x1d3   :  { %2165 = vmatpush1.bf16.msra.mxu0 %v3506_v34  ;;  %2337 = vmatpush1.bf16.msra.mxu1 %v3509_v35  ;;  %v3591_v34 = vld [vmem:[#allocation10 + $0x88] sm:$0xff]   ;;  %v3592_v35 = vld [vmem:[#allocation10 + $0x50] sm:$0xff]  }
 0x1d4   :  { %2166 = vmatprep.subr.bf16.mxu0 %v3514_v43  ;;  %2338 = vmatprep.subr.bf16.mxu1 %v3517_v45  ;;  %v3593_v43 = vld [vmem:[#allocation10 + $0xd0] sm:$0xff]  }
 0x1d5   :  { %v3594_v45 = vld [vmem:[#allocation10 + $0x10] sm:$0xff]  }
 0x1d7   :  { %2167 = vmatpush1.bf16.msra.mxu0 %v3512_v46  ;;  %2339 = vmatpush1.bf16.msra.mxu1 %v3515_v44  ;;  %v3595_v46 = vld [vmem:[#allocation10 + $0x90] sm:$0xff]   ;;  %v3596_v44 = vld [vmem:[#allocation10 + $0x58] sm:$0xff]  }
 0x1d8   :  { %2168 = vmatprep.subr.bf16.mxu0 %v3520_v47  ;;  %2340 = vmatprep.subr.bf16.mxu1 %v3523_v48  ;;  %v3597_v47 = vld [vmem:[#allocation10 + $0xd8] sm:$0xff]  }
 0x1d9   :  { %v3598_v48 = vld [vmem:[#allocation10 + $0x18] sm:$0xff]  }
 0x1db   :  { %2169 = vmatpush1.bf16.msra.mxu0 %v3518_v49  ;;  %2341 = vmatpush1.bf16.msra.mxu1 %v3521_v50  ;;  %v3600_v49 = vld [vmem:[#allocation10 + $0x60] sm:$0xff]  }
 0x1dc   :  { %2170 = vmatprep.subr.bf16.mxu0 %v3526_v51  ;;  %2342 = vmatprep.subr.bf16.mxu1 %v3529_v52  ;;  %v3601_v50 = vld [vmem:[#allocation10 + $0xe0] sm:$0xff]  }
 0x1dd   :  { %v3602_v51 = vld [vmem:[#allocation10 + $0x20] sm:$0xff]  }
 0x1de   :  { %v3603_v52 = vld [vmem:[#allocation10 + $0xa0] sm:$0xff]  }
 0x1df   :  { %2171 = vmatpush1.bf16.msra.mxu0 %v3524_v53  ;;  %2343 = vmatpush1.bf16.msra.mxu1 %v3527_v54  ;;  %v3604_v53 = vld [vmem:[#allocation10 + $0x68] sm:$0xff]  }
 0x1e0   :  { %2172 = vmatprep.subr.bf16.mxu0 %v3532_v57  ;;  %2344 = vmatprep.subr.bf16.mxu1 %v3535_v58  ;;  %v3605_v54 = vld [vmem:[#allocation10 + $0xe8] sm:$0xff]  }
 0x1e1   :  { %v3606_v57 = vld [vmem:[#allocation10 + $0x28] sm:$0xff]  }
 0x1e2   :  { %v3607_v58 = vld [vmem:[#allocation10 + $0xa8] sm:$0xff]  }
 0x1e3   :  { %2173 = vmatpush1.bf16.msra.mxu0 %v3530_v59  ;;  %2345 = vmatpush1.bf16.msra.mxu1 %v3533_v56  ;;  %v3608_v59 = vld [vmem:[#allocation10 + $0x70] sm:$0xff]  }
 0x1e4   :  { %2174 = vmatprep.subr.bf16.mxu0 %v3538_v61  ;;  %2346 = vmatprep.subr.bf16.mxu1 %v3541_v62  ;;  %v3609_v56 = vld [vmem:[#allocation10 + $0xf0] sm:$0xff]  }
 0x1e5   :  { %v3610_v61 = vld [vmem:[#allocation10 + $0x30] sm:$0xff]  }
 0x1e6   :  { %v3611_v62 = vld [vmem:[#allocation10 + $0xb0] sm:$0xff]  }
 0x1e7   :  { %2175 = vmatpush1.bf16.msra.mxu0 %v3536_v63  ;;  %2347 = vmatpush1.bf16.msra.mxu1 %v3539_v0  ;;  %v3612_v63 = vld [vmem:[#allocation10 + $0x78] sm:$0xff]  }
 0x1e8   :  { %2176 = vmatprep.subr.bf16.mxu0 %v3544_v1  ;;  %2348 = vmatprep.subr.bf16.mxu1 %v3547_v2  ;;  %v3613_v0 = vld [vmem:[#allocation10 + $0xf8] sm:$0xff]  }
 0x1e9   :  { %v3614_v1 = vld [vmem:[#allocation10 + $0x38] sm:$0xff]  }
 0x1ea   :  { %v3615_v2 = vld [vmem:[#allocation10 + $0xb8] sm:$0xff]  }
 0x1eb   :  { %2177 = vmatpush1.bf16.msra.mxu0 %v3542_v3  ;;  %2349 = vmatpush1.bf16.msra.mxu1 %v3545_v4  ;;  %v727_v3 = vld [vmem:[%s3977_s4] sm:$0xf] }
 0x1ec   :  { %2178 = vmatprep.subr.bf16.mxu0 %v3550_v5  ;;  %2350 = vmatprep.subr.bf16.mxu1 %v3553_v6  ;;  %v732_v4 = vrot.slane %v727_v3, %v116_v38  ;;  %v740_v5 = vrot.slane %v727_v3, %v124_v41  ;;  %v736_v6 = vrot.slane %v727_v3, %v120_v40 }
 0x1ef   :  { %2179 = vmatpush1.bf16.msra.mxu0 %v3548_v7  ;;  %2351 = vmatpush1.bf16.msra.mxu1 %v3551_v8  ;;  %v744_v7 = vrot.slane %v727_v3, %v128_v42 }
 0x1f0   :  { %2180 = vmatprep.subr.bf16.mxu0 %v3556_v9  ;;  %2352 = vmatprep.subr.bf16.mxu1 %v3559_v10 }
 0x1f3   :  { %2181 = vmatpush1.bf16.msra.mxu0 %v3554_v11  ;;  %2353 = vmatpush1.bf16.msra.mxu1 %v3557_v12 }
 0x1f4   :  { %2182 = vmatprep.subr.bf16.mxu0 %v3562_v13  ;;  %2354 = vmatprep.subr.bf16.mxu1 %v3565_v14 }
 0x1f7   :  { %2183 = vmatpush1.bf16.msra.mxu0 %v3560_v15  ;;  %2355 = vmatpush1.bf16.msra.mxu1 %v3563_v16 }
 0x1f8   :  { %2184 = vmatprep.subr.bf16.mxu0 %v3568_v17  ;;  %2356 = vmatprep.subr.bf16.mxu1 %v3571_v18 }
 0x1fb   :  { %2185 = vmatpush1.bf16.msra.mxu0 %v3566_v19  ;;  %2357 = vmatpush1.bf16.msra.mxu1 %v3569_v20 }
 0x1fc   :  { %2186 = vmatprep.subr.bf16.mxu0 %v3574_v21  ;;  %2358 = vmatprep.subr.bf16.mxu1 %v3577_v22 }
 0x1ff   :  { %2187 = vmatpush1.bf16.msra.mxu0 %v3572_v23  ;;  %2359 = vmatpush1.bf16.msra.mxu1 %v3575_v24 }
 0x200   :  { %2188 = vmatprep.subr.bf16.mxu0 %v3580_v25  ;;  %2360 = vmatprep.subr.bf16.mxu1 %v3583_v32 }
 0x203   :  { %2189 = vmatpush1.bf16.msra.mxu0 %v3578_v26  ;;  %2361 = vmatpush1.bf16.msra.mxu1 %v3581_v27 }
 0x204   :  { %3106 = vmatprep.subr.bf16.mxu0 %v3584_v39  ;;  %3128 = vmatprep.subr.bf16.mxu1 %v3585_v29 }
 0x206   :  { %2191 = vmatmul.mubr.bf16.vlgmr.msra.gmra.mrb[8].mxu0 %v3930_v28  ;;  %2363 = vmatmul.mubr.bf16.vlgmr.msra.gmra.mrb[8].mxu1 %v3930_v28  ;;  %v3599_v28 = vld [vmem:[#allocation10 + $0x98] sm:$0xff]  }
 0x207   :  { %3107 = vmatpush3.bf16.msra.mxu0 %v3586_v30  ;;  %3129 = vmatpush3.bf16.msra.mxu1 %v3587_v60 }
 0x208   :  { %3108 = vmatprep.subr.bf16.mxu0 %v3588_v31  ;;  %3130 = vmatprep.subr.bf16.mxu1 %v3589_v33 }
 0x20b   :  { %3109 = vmatpush3.bf16.msra.mxu0 %v3590_v55  ;;  %3131 = vmatpush3.bf16.msra.mxu1 %v3591_v34 }
 0x20c   :  { %3110 = vmatprep.subr.bf16.mxu0 %v3592_v35  ;;  %3132 = vmatprep.subr.bf16.mxu1 %v3593_v43 }
 0x20f   :  { %3111 = vmatpush3.bf16.msra.mxu0 %v3594_v45  ;;  %3133 = vmatpush3.bf16.msra.mxu1 %v3595_v46 }
 0x210   :  { %3112 = vmatprep.subr.bf16.mxu0 %v3596_v44  ;;  %3134 = vmatprep.subr.bf16.mxu1 %v3597_v47  ;;  %v3071_v44 = vld [vmem:[%s3979_s6] ss:$0 sm:$0xff]  ;;  %s3778_s6 = smov [#allocation11]  }
 0x211   :  { %s2780_s17 = sshll.u32 %s3778_s6, 4  ;;  %s2781_s17 = int_to_ptr.vmem [resolvable:$true] %s2780_s17 }
 0x212   :  { %s3734_s18 = scalar_lea.vmem %s2781_s17, 256  ;;  %p3739_p13 = scmp.lt.s32.totalorder %s2781_s17, %s2781_s17 }
 0x213   :  { %3113 = vmatpush3.bf16.msra.mxu0 %v3598_v48  ;;  %3135 = vmatpush3.bf16.msra.mxu1 %v3599_v28  ;;  %p3735_p12 = scmp.ne.s32.totalorder %s2781_s17, %s3734_s18  ;;  %p3740_p0 = scmp.lt.s32.totalorder %s3734_s18, %s3734_s18 }
 0x214   :  { %3114 = vmatprep.subr.bf16.mxu0 %v3600_v49  ;;  %3136 = vmatprep.subr.bf16.mxu1 %v3601_v50 }
 0x215   :  { %p3741_p1 = por %p3740_p0, %p3739_p13 }
 0x217   :  { %3115 = vmatpush3.bf16.msra.mxu0 %v3602_v51  ;;  %3137 = vmatpush3.bf16.msra.mxu1 %v3603_v52  ;;  %p3742_p2 = pnand %p3741_p1, %p3735_p12 }
 0x218   :  { %3116 = vmatprep.subr.bf16.mxu0 %v3604_v53  ;;  %3138 = vmatprep.subr.bf16.mxu1 %v3605_v54 }
 0x21b   :  { %3117 = vmatpush3.bf16.msra.mxu0 %v3606_v57  ;;  %3139 = vmatpush3.bf16.msra.mxu1 %v3607_v58 }
 0x21c   :  { %3118 = vmatprep.subr.bf16.mxu0 %v3608_v59  ;;  %3140 = vmatprep.subr.bf16.mxu1 %v3609_v56 }
 0x21f   :  { %3119 = vmatpush3.bf16.msra.mxu0 %v3610_v61  ;;  %3141 = vmatpush3.bf16.msra.mxu1 %v3611_v62 }
 0x220   :  { %3120 = vmatprep.subr.bf16.mxu0 %v3612_v63  ;;  %3142 = vmatprep.subr.bf16.mxu1 %v3613_v0  ;;  %v2759_v0 = vand.u32 127, %v114_v36 }
 0x222   :  { %vm2762_vm9 = vcmp.eq.s32.totalorder %v2759_v0, 2  ;;  %vm2761_vm10 = vcmp.eq.s32.totalorder %v2759_v0, 1  ;;  %vm2760_vm11 = vcmp.eq.s32.totalorder %v2759_v0, 0  ;;  %vm2766_vm12 = vcmp.lt.s32.totalorder %v2759_v0, 3 }
 0x223   :  { %3121 = vmatpush3.bf16.msra.mxu0 %v3614_v1  ;;  %3143 = vmatpush3.bf16.msra.mxu1 %v3615_v2 }
 0x2d9   :  { %v2192_v8 = vpop.f32.mrb[8].mxu0  ;;  %v2364_v9 = vpop.f32.mrb[8].mxu1 }
 0x2da   :  { %v3150_v10 = vadd.f32 %v2192_v8, %v732_v4  ;;  %v3154_v11 = vadd.f32 %v2364_v9, %v740_v5  ;;  %v2194_v12 = vpop.f32.mrb[9].mxu0  ;;  %v2366_v13 = vpop.f32.mrb[9].mxu1  ;;  %v3777_v9 = vmov 0.0  }
 0x2db   :  { %v3151_v14 = vadd.f32 %v2194_v12, %v736_v6  ;;  %v3155_v15 = vadd.f32 %v2366_v13, %v744_v7  ;;  %v2196_v16 = vpop.f32.mrb[10].mxu0  ;;  %v2368_v17 = vpop.f32.mrb[10].mxu1 }
 0x2dc   :  { %vm2373_vm1 = vcmp.gt.f32.partialorder %v3150_v10, 0.0  ;;  %v2381_v38 = vmul.f32 0.01, %v3150_v10  ;;  %vm2375_vm2 = vcmp.gt.f32.partialorder %v3154_v11, 0.0  ;;  %v2383_v41 = vmul.f32 0.01, %v3154_v11 }
 0x2dd   :  { %vm2374_vm3 = vcmp.gt.f32.partialorder %v3151_v14, 0.0  ;;  %v2382_v18 = vmul.f32 0.01, %v3151_v14  ;;  %vm2376_vm4 = vcmp.gt.f32.partialorder %v3155_v15, 0.0  ;;  %v2384_v40 = vmul.f32 0.01, %v3155_v15 }
 0x2de   :  { %v3152_v37 = vadd.f32 %v2196_v16, %v732_v4  ;;  %v3156_v42 = vadd.f32 %v2368_v17, %v740_v5  ;;  %v2198_v19 = vpop.f32.mrb[11].mxu0  ;;  %v2370_v20 = vpop.f32.mrb[11].mxu1  ;;  %v2389_v21 = vsel %vm2373_vm1, %v3150_v10, %v2381_v38  ;;  %v2391_v22 = vsel %vm2375_vm2, %v3154_v11, %v2383_v41 }
 0x2df   :  { %v3153_v23 = vadd.f32 %v2198_v19, %v736_v6  ;;  %v3157_v24 = vadd.f32 %v2370_v20, %v744_v7  ;;  %v2390_v30 = vsel %vm2374_vm3, %v3151_v14, %v2382_v18  ;;  %v2392_v60 = vsel %vm2376_vm4, %v3155_v15, %v2384_v40 }
 0x2e0   :  { %vm2377_vm5 = vcmp.gt.f32.partialorder %v3152_v37, 0.0  ;;  %v2385_v25 = vmul.f32 0.01, %v3152_v37  ;;  %vm2379_vm6 = vcmp.gt.f32.partialorder %v3156_v42, 0.0  ;;  %v2387_v32 = vmul.f32 0.01, %v3156_v42 }
 0x2e1   :  { %vm2378_vm7 = vcmp.gt.f32.partialorder %v3153_v23, 0.0  ;;  %v2386_v26 = vmul.f32 0.01, %v3153_v23  ;;  %vm2380_vm8 = vcmp.gt.f32.partialorder %v3157_v24, 0.0  ;;  %v2388_v27 = vmul.f32 0.01, %v3157_v24 }
 0x2e2   :  { %v2393_v39 = vsel %vm2377_vm5, %v3152_v37, %v2385_v25  ;;  %v2395_v29 = vsel %vm2379_vm6, %v3156_v42, %v2387_v32  ;;  %v3776_v5 = vmov 1.0   ;;  %v2767_v10 = vsel %vm2766_vm12, 0.1, %v3777_v9 }
 0x2e3   :  { %v2397_v31 = vpack.c.bf16 %v2393_v39, %v2389_v21  ;;  %v2399_v33 = vpack.c.bf16 %v2395_v29, %v2391_v22  ;;  %v2394_v55 = vsel %vm2378_vm7, %v3153_v23, %v2386_v26  ;;  %v2396_v34 = vsel %vm2380_vm8, %v3157_v24, %v2388_v27 }
 0x2e4   :  { %v2398_v35 = vpack.c.bf16 %v2394_v55, %v2390_v30  ;;  %v2400_v43 = vpack.c.bf16 %v2396_v34, %v2392_v60  ;;  %v2763_v6 = vsel %vm2762_vm9, 0.083333336, %v3776_v5 }
 0x2e5   :  { %v2764_v7 = vsel %vm2761_vm10, 0.1, %v2763_v6 }
 0x2e6   :  { %2696 = vmatprep.mubr.bf16.mxu0 %v2398_v35  ;;  %2737 = vmatprep.mubr.bf16.mxu1 %v2400_v43  ;;  %v2765_v8 = vsel %vm2760_vm11, 0.125, %v2764_v7 }
 0x2e7   :  { %2697 = vmatmul.mubr.bf16.vlgmr.msra.gmra.mrb[12].mxu0 %v2397_v31  ;;  %2738 = vmatmul.mubr.bf16.vlgmr.msra.gmra.mrb[12].mxu1 %v2399_v33  ;;  %v2768_v11 = vmul.f32 %v2767_v10, %v2765_v8 }
 0x3ba   :  { %v3122_v45 = vpop.f32.mrb[12].mxu0  ;;  %v3144_v46 = vpop.f32.mrb[12].mxu1 }
 0x3bb   :  { %v3123_v47 = vpop.f32.mrb[13].mxu0  ;;  %v3145_v48 = vpop.f32.mrb[13].mxu1 }
 0x3bc   :  { %v3124_v28 = vadd.f32 %v3123_v47, %v3122_v45  ;;  %v3146_v49 = vadd.f32 %v3145_v48, %v3144_v46  ;;  %v3125_v50 = vpop.f32.mrb[14].mxu0  ;;  %v3147_v51 = vpop.f32.mrb[14].mxu1 }
 0x3bd   :  { %v3126_v52 = vpop.f32.mrb[15].mxu0  ;;  %v3148_v53 = vpop.f32.mrb[15].mxu1 }
 0x3be   :  { %v2699_v54 = vadd.f32 %v3124_v28, %v3071_v44  ;;  %v3127_v57 = vadd.f32 %v3126_v52, %v3125_v50  ;;  %v3149_v58 = vadd.f32 %v3148_v53, %v3147_v51 }
 0x3c0   :  { %v2740_v59 = vadd.f32 %v3146_v49, %v2699_v54  ;;  %v2702_v56 = vadd.f32 %v3127_v57, %v3071_v44 }
 0x3c2   :  { %v3104_v61 = vmul.f32 -1.442695, %v2740_v59  ;;  %v2743_v62 = vadd.f32 %v3149_v58, %v2702_v56 }
 0x3c4   :  { %3616 = vpow2.f32 %v3104_v61  ;;  %v3105_v63 = vmul.f32 -1.442695, %v2743_v62 }
 0x3c6   :  { %3618 = vpow2.f32 %v3105_v63 }
 0x3ce   :  { %v3617_v1 = vpop.eup %3616 }
 0x3cf   :  { %v2752_v2 = vadd.f32 1.0, %v3617_v1 }
 0x3d0   :  { %v3619_v3 = vpop.eup %3618 }
 0x3d1   :  { %3620 = vrcp.f32 %v2752_v2  ;;  %v2753_v4 = vadd.f32 1.0, %v3619_v3 }
 0x3d3   :  { %3622 = vrcp.f32 %v2753_v4 }
 0x3db   :  { %v3621_v12 = vpop.eup %3620 }
 0x3dc   :  { %v2769_v13 = vmul.f32 %v3621_v12, %v2765_v8 }
 0x3dd   :  { %v3623_v36 = vpop.eup %3622 }
 0x3de   :  { %v2770_v14 = vmul.f32 %v3623_v36, %v2765_v8  ;;  %v2771_v15 = vadd.f32 %v2769_v13, %v2768_v11 }
 0x3e0   :  { %v2772_v16 = vadd.f32 %v2770_v14, %v2768_v11  ;;  %2773 = vst [vmem:[#allocation11] sm:$0xff] %v2771_v15 }
 0x3e2   :  { %2774 = vst [vmem:[#allocation11 + $0x8] sm:$0xff] %v2772_v16 }
 0x3e3   :  { %3745 = shalt.err (!%p3742_p2)
}
 0x3e4   :  { %s3746_s21 = scalar_lea.hbm %s3980_s7, 256 }
 0x3e5   :  { %p3747_p3 = scmp.ne.s32.totalorder %s3980_s7, %s3746_s21  ;;  %p3750_p4 = scmp.lt.u32.totalorder %s3746_s21, %s3980_s7 }
 0x3e7   :  { %p3752_p5 = pnand %p3750_p4, %p3747_p3 }
 0x3e9   :  { %3755 = shalt.err (!%p3752_p5)
}
 0x3ea   :  { %s3779_s25 = smov 128   ;;  %s3780_s26 = smov 8  }
 0x3eb   :  { %2786 = dma.vmem_to_hbm [thread:$0]  %s2781_s17, 256, %s3980_s7, [#allocation4], %s3779_s25, %s3779_s25, %s3780_s26  }
 0x3ec   :  { %3762 = dma.done.wait [#allocation4], 256  }
 0x3ed   :  { %3763 = vsyncadd [#allocation4], 4294967040 }
 0x3ee   :  { %2790 = vsyncpa [#allocation3], 1 }
 0x3ef   :  { %2791 = vsyncpa [#allocation6], 1 }
 0x3f0   :  { %2792 = vsyncpa [#allocation9], 1 }
 0x3f1   :  { %2793 = vsyncpa [#allocation4], 1 }

</bundles_post_ra>
